<compile_context>
chip_gen: v7x
topology: tpu7x:2x2x1
jax: 0.10.0
libtpu: 0.0.40
codegen_flags: <defaults>
</compile_context>

<pallas_src>
import jax
import jax.numpy as jnp
from jax.experimental import pallas as pl
from jax.experimental.pallas import tpu as pltpu

K_NEIGHBORS = 32
BN_EPS = 1e-5
LRELU_SLOPE = 0.01


def _round_up(x, m):
    return (x + m - 1) // m * m


def _rup8(n):
    return _round_up(n, 8)


def _pad2d(a, rows, cols):
    return jnp.pad(a, ((0, rows - a.shape[0]), (0, cols - a.shape[1])))


def _phys_vmem_bytes():
    try:
        return int(pltpu.get_tpu_info().vmem_capacity_bytes)
    except Exception:
        return 64 * 1024 * 1024          # conservative (v7x per-TC) fallback


def _elementwise_bf16_ok():
    # bf16 VALU exists on v6e / v7x; keep f32 elementwise on v5e / older.
    try:
        kind = jax.devices()[0].device_kind.lower()
    except Exception:
        return False
    return ("v6" in kind) or ("v7" in kind)


def _plan_tiles(m_pts, cg_p, c_max_p, cf_p, c2_p, inter_bytes):
    """Pick lane tile tm (multiple of 128) under a VMEM budget, keep >=~8 tiles."""
    phys = _phys_vmem_bytes()
    budget = phys // 4                                   # per-step working set
    # bytes per point inside one grid step:
    #   xg (bf16, double-buffered)  +  ~3 live (c_max_p, K*tm) intermediates
    per_pt = K_NEIGHBORS * (2 * 2 * cg_p + 3 * inter_bytes * c_max_p)
    per_pt += 2 * 4 * (cf_p + c2_p)                      # f1 / out columns (approx)
    tm_cap = max(128, min(2048, (budget // per_pt) // 128 * 128))
    # keep ~8+ grid steps when possible (v7x megacore balance, pipeline ramp)
    tm_tgt = max(128, _round_up((m_pts + 7) // 8, 128))
    tm = min(tm_cap, tm_tgt)
    m_pad = _round_up(m_pts, tm)
    vmem_limit = min(phys * 3 // 4, 112 * 1024 * 1024)
    return tm, m_pad, m_pad // tm, int(vmem_limit)


# ----------------------------------------------------------------------------
# Pallas kernel: fused (1x1 conv -> folded BN -> leaky_relu) x 3  +  max over K
#   xg_ref : (1, Cg_p, K*tm)  bf16   gathered channels [pos_diff, feat2_grouped]
#   f1_ref : (Cf_p, tm)       bf16   un-replicated feature1 channels
#   w*/b*  : folded conv/BN weights (channels padded to multiples of 8);
#            w1/w2 dtype selects the elementwise/intermediate precision.
#   o_ref  : (C2_p, tm)              lane-dense output tile
# ----------------------------------------------------------------------------
def _flowemb_mlp_kernel(xg_ref, f1_ref, w0a_ref, w0b_ref, b0_ref,
                        w1_ref, b1_ref, w2_ref, b2_ref, o_ref):
    tm = o_ref.shape[-1]
    cdt = w1_ref.dtype       # bf16 on v6e/v7x, f32 on v5e (chosen in the wrapper)

    xg = xg_ref[0]                                                # (Cg_p, K*tm)
    # layer 0: gathered part on the MXU in bf16 (f32 accumulate) ...
    h = jnp.dot(w0a_ref[...], xg, preferred_element_type=jnp.float32)
    # ... feature1 part computed once per point (k-independent, conv linearity)
    hb = jnp.dot(w0b_ref[...], f1_ref[...],
                 preferred_element_type=jnp.float32) + b0_ref[...]  # (C0_p, tm)
    # TODO(synk): verify in the bundle dump that this tile-broadcast + add +
    # leaky_relu fuses per-vreg on v5e (single vst slot) instead of
    # materializing the tiled tensor.
    h = h + jnp.tile(hb, (1, K_NEIGHBORS))                          # (C0_p, K*tm)
    h = jnp.maximum(h, LRELU_SLOPE * h).astype(cdt)                 # leaky_relu

    # layers 1 and 2: MXU accumulates in f32, big intermediates kept in `cdt`
    h = jnp.dot(w1_ref[...], h, preferred_element_type=jnp.float32) + b1_ref[...]
    h = jnp.maximum(h, LRELU_SLOPE * h).astype(cdt)
    h = jnp.dot(w2_ref[...], h, preferred_element_type=jnp.float32) + b2_ref[...]
    h = jnp.maximum(h, LRELU_SLOPE * h).astype(cdt)

    # max-pool over the K neighbors: lanes are k-major within the tile, so
    # neighbor k is the aligned lane slab [k*tm, (k+1)*tm).  Pairwise tree
    # (5 levels) instead of a 31-deep serial dependence chain.
    parts = [h[:, k * tm:(k + 1) * tm] for k in range(K_NEIGHBORS)]
    while len(parts) > 1:
        parts = [jnp.maximum(parts[2 * i], parts[2 * i + 1])
                 for i in range(len(parts) // 2)]
    o_ref[...] = parts[0].astype(o_ref.dtype)


def _mlp_maxpool(xg, f1, p, *, tm, out_dtype, vmem_limit):
    """xg: (n_tiles, Cg_p, K*tm) bf16; f1: (Cf_p, m_pad) bf16 -> (C2_p, m_pad)."""
    n_tiles, cg_p, ktm = xg.shape
    cf_p, m_pad = f1.shape
    c0_p, c1_p, c2_p = p["c0_p"], p["c1_p"], p["c2_p"]
    assert ktm == K_NEIGHBORS * tm and m_pad == n_tiles * tm

    def const_spec(a):
        nd = a.ndim
        return pl.BlockSpec(a.shape, lambda i, _nd=nd: (0,) * _nd)

    out_bytes = jnp.dtype(out_dtype).itemsize
    flops = 2 * m_pad * (K_NEIGHBORS * (cg_p * c0_p + c0_p * c1_p + c1_p * c2_p)
                         + cf_p * c0_p)
    bytes_accessed = (n_tiles * cg_p * ktm * 2            # xg (bf16)
                      + cf_p * m_pad * 2                  # f1 (bf16)
                      + c2_p * m_pad * out_bytes          # output
                      + (c0_p * cg_p + c0_p * cf_p) * 2
                      + (c0_p + c1_p * c0_p + c1_p + c2_p * c1_p + c2_p) * 4)

    # TODO(synk): passing idx via PrefetchScalarGridSpec and gathering feat2 /
    # pos2 in-kernel (un-replicated HBM streams) would remove the K-replicated
    # xg stream entirely; kept as a follow-up since the gather lands on lanes.
    return pl.pallas_call(
        _flowemb_mlp_kernel,
        out_shape=jax.ShapeDtypeStruct((c2_p, m_pad), out_dtype),
        grid_spec=pltpu.PrefetchScalarGridSpec(
            num_scalar_prefetch=0,
            grid=(n_tiles,),
            in_specs=[
                pl.BlockSpec((1, cg_p, ktm), lambda i: (i, 0, 0)),
                pl.BlockSpec((cf_p, tm), lambda i: (0, i)),
                const_spec(p["w0a"]), const_spec(p["w0b"]), const_spec(p["b0"]),
                const_spec(p["w1"]), const_spec(p["b1"]),
                const_spec(p["w2"]), const_spec(p["b2"]),
            ],
            out_specs=pl.BlockSpec((c2_p, tm), lambda i: (0, i)),
        ),
        compiler_params=pltpu.CompilerParams(
            dimension_semantics=("parallel",),
            vmem_limit_bytes=vmem_limit),
        cost_estimate=pl.CostEstimate(
            flops=int(flops), transcendentals=0,
            bytes_accessed=int(bytes_accessed)),
    )(xg, f1, p["w0a"], p["w0b"], p["b0"], p["w1"], p["b1"], p["w2"], p["b2"])


# ----------------------------------------------------------------------------
# FlowEmbedding forward (KNN/gather glue in JAX, hot path in Pallas)
# ----------------------------------------------------------------------------
def flow_embedding_forward(pos1, pos2, feat1, feat2, params, radius,
                           out_dtype=jnp.float32):
    """pos*: (B, 3, N), feat*: (B, C, N).  Returns (B, mlp[-1], N) in out_dtype."""
    del radius  # ball-query + same-rank KNN fallback == plain KNN (see header)
    B, _, N = pos1.shape
    C = params["c_feat"]
    assert feat1.shape[1] == C and feat2.shape[1] == C

    p1t = jnp.transpose(pos1, (0, 2, 1)).astype(jnp.float32)   # (B, N, 3)
    p2t = jnp.transpose(pos2, (0, 2, 1)).astype(jnp.float32)   # (B, N, 3)

    # Pairwise distances in matmul form (MXU, no (B,N,N,3) intermediate).
    # TODO(synk): the top_k + neighbor gather itself stays in plain JAX
    # (data-dependent sort/gather).
    inner = jnp.einsum("bic,bjc->bij", p1t, p2t)               # (B, N, N)
    n1 = jnp.sum(p1t * p1t, axis=-1)                           # (B, N)
    n2 = jnp.sum(p2t * p2t, axis=-1)                           # (B, N)
    sq_dist = n1[:, :, None] + n2[:, None, :] - 2.0 * inner
    _, idx = jax.lax.top_k(-sq_dist, K_NEIGHBORS)              # (B, N, K)

    batch_idx = jnp.arange(B)[:, None, None]
    # pos_diff in f32 (cancellation-sensitive), cast right after; feat2 is
    # cast to bf16 BEFORE the gather so the K-replicated stream is bf16-only.
    pos_diff = (p2t[batch_idx, idx] - p1t[:, :, None, :]).astype(jnp.bfloat16)
    f2t_bf = jnp.transpose(feat2, (0, 2, 1)).astype(jnp.bfloat16)   # (B, N, C)
    feat2_grouped = f2t_bf[batch_idx, idx]                     # (B, N, K, C) bf16

    cg, cg_p, cf_p = 3 + C, params["cg_p"], params["cf_p"]
    c_max_p = max(params["c0_p"], params["c1_p"], params["c2_p"], cg_p)
    M = B * N
    tm, m_pad, n_tiles, vmem_limit = _plan_tiles(
        M, cg_p, c_max_p, cf_p, params["c2_p"], params["inter_bytes"])

    # Only the neighbor-dependent channels go to HBM (torch concat order is
    # [pos_diff, feat2_grouped, feature1]; the feature1 block is handled
    # un-replicated inside the kernel via the split first-layer weight).
    xg = jnp.concatenate([pos_diff, feat2_grouped], axis=-1)   # (B,N,K,3+C) bf16
    xg = xg.reshape(M, K_NEIGHBORS, cg)
    xg = jnp.pad(xg, ((0, m_pad - M), (0, 0), (0, cg_p - cg)))
    # (n_tiles, Cg_p, K*tm) with k-major lane ordering inside each tile
    xg = xg.reshape(n_tiles, tm, K_NEIGHBORS, cg_p).transpose(0, 3, 2, 1)
    xg = xg.reshape(n_tiles, cg_p, K_NEIGHBORS * tm)

    f1 = feat1.astype(jnp.bfloat16).transpose(1, 0, 2).reshape(C, M)
    f1 = jnp.pad(f1, ((0, cf_p - C), (0, m_pad - M)))          # (Cf_p, m_pad)

    out = _mlp_maxpool(xg, f1, params, tm=tm, out_dtype=out_dtype,
                       vmem_limit=vmem_limit)                  # (C2_p, m_pad)
    c_out = params["c_out"]
    out = out[:c_out, :M].reshape(c_out, B, N).transpose(1, 0, 2)
    return out                                                 # (B, mlp[-1], N)


# ----------------------------------------------------------------------------
# FlowModule forward
# ----------------------------------------------------------------------------
def flow_module_forward(feature_lst, pos_lst, layer_params, cutoff):
    features = list(feature_lst)
    n_layers = len(layer_params)
    assert len(features) == n_layers + 1
    for depth in range(n_layers):
        params = layer_params[depth]
        # intermediate outputs feed the next layer's bf16 gathered stream,
        # so emit them in bf16; the final module output stays f32.
        out_dtype = jnp.float32 if depth == n_layers - 1 else jnp.bfloat16
        mix_num = len(features) - 1
        features = [
            flow_embedding_forward(pos_lst[l], pos_lst[l + 1],
                                   features[l], features[l + 1],
                                   params, cutoff, out_dtype=out_dtype)
            for l in range(mix_num)
        ]
    assert len(features) == 1
    return features[-1]


# ----------------------------------------------------------------------------
# Parameter construction: Conv2d 1x1 (no bias) + folded BatchNorm2d, then
# split / transposed / channel-padded into the kernel-friendly layout.
# ----------------------------------------------------------------------------
def make_flow_embedding_params(key, in_channel, mlp, compute_dtype=jnp.float32):
    assert len(mlp) == 3
    last = in_channel * 2 + 3
    raw = []
    for out_c in mlp:
        key, kw, kg, kb, km, kv = jax.random.split(key, 6)
        w = 0.1 * jax.random.normal(kw, (last, out_c), jnp.float32)
        gamma = 1.0 + 0.1 * jax.random.normal(kg, (out_c,), jnp.float32)
        beta = 0.1 * jax.random.normal(kb, (out_c,), jnp.float32)
        run_mean = 0.1 * jax.random.normal(km, (out_c,), jnp.float32)
        run_var = jnp.abs(jax.random.normal(kv, (out_c,), jnp.float32)) + 0.5
        scale = gamma / jnp.sqrt(run_var + BN_EPS)
        w_eff = w * scale[None, :]                 # (last, out_c), BN folded
        b_eff = beta - run_mean * scale            # (out_c,)
        raw.append((w_eff, b_eff))
        last = out_c

    C = in_channel
    cg, cf = 3 + C, C
    c0, c1, c2 = mlp
    cg_p, cf_p = _rup8(cg), _rup8(cf)
    c0_p, c1_p, c2_p = _rup8(c0), _rup8(c1), _rup8(c2)
    (w0, b0), (w1, b1), (w2, b2) = raw

    return dict(
        # first-layer weight split: gathered channels (bf16, MXU) vs feature1
        w0a=_pad2d(w0[:cg].T, c0_p, cg_p).astype(jnp.bfloat16),
        w0b=_pad2d(w0[cg:].T, c0_p, cf_p).astype(jnp.bfloat16),
        b0=_pad2d(b0[:, None], c0_p, 1),
        w1=_pad2d(w1.T, c1_p, c0_p).astype(compute_dtype),
        b1=_pad2d(b1[:, None], c1_p, 1),
        w2=_pad2d(w2.T, c2_p, c1_p).astype(compute_dtype),
        b2=_pad2d(b2[:, None], c2_p, 1),
        c_feat=C, c_out=c2,
        cg_p=cg_p, cf_p=cf_p, c0_p=c0_p, c1_p=c1_p, c2_p=c2_p,
        inter_bytes=int(jnp.dtype(compute_dtype).itemsize),
    )


def build_flow_module_params(key, in_feat, hidden_feat, out_feat,
                             sequence_length, compute_dtype=jnp.float32):
    if sequence_length < 1:
        raise Exception("Flow module only accepts sequence with length greater than 1")
    depth_total = sequence_length - 1
    if depth_total == 1:
        hidden_feat = out_feat
    layers = []
    for depth in range(depth_total):
        key, sub = jax.random.split(key)
        if depth == 0:
            layers.append(make_flow_embedding_params(
                sub, in_feat, [in_feat, hidden_feat // 2, hidden_feat],
                compute_dtype))
        elif depth == depth_total - 1:
            layers.append(make_flow_embedding_params(
                sub, hidden_feat, [hidden_feat, out_feat, out_feat],
                compute_dtype))
        else:
            layers.append(make_flow_embedding_params(
                sub, hidden_feat, [hidden_feat, hidden_feat // 2, hidden_feat],
                compute_dtype))
    return layers


# ----------------------------------------------------------------------------
if __name__ == "__main__":
    key = jax.random.PRNGKey(0)

    B, N = 2, 512                # batch, points per cloud (N >= 32 for K=32)
    in_feat, hidden_feat, out_feat = 4, 8, 8
    sequence_length = 3          # -> depth = 2 FlowEmbedding layers
    cutoff = 0.5                 # ball-query radius (no effect, see header)

    # bf16 elementwise intermediates on v6e/v7x, f32 on v5e/others
    compute_dtype = jnp.bfloat16 if _elementwise_bf16_ok() else jnp.float32

    key, kp = jax.random.split(key)
    layer_params = build_flow_module_params(
        kp, in_feat, hidden_feat, out_feat, sequence_length, compute_dtype)

    keys = jax.random.split(key, 2 * sequence_length)
    feature_lst = [jax.random.normal(keys[i], (B, in_feat, N), jnp.float32)
                   for i in range(sequence_length)]
    pos_lst = [jax.random.normal(keys[sequence_length + i], (B, 3, N), jnp.float32)
               for i in range(sequence_length)]

    out = flow_module_forward(feature_lst, pos_lst, layer_params, cutoff)
    out = jax.block_until_ready(out)

    assert out.shape == (B, out_feat, N), out.shape
    assert bool(jnp.all(jnp.isfinite(out)))
    print("KERNEL_OK")
</pallas_src>

<mosaic_0001>
module attributes {stable_mosaic.version = 11 : i64} {
  func.func @_flowemb_mlp_kernel(%arg0: i32, %arg1: memref<1x8x4096xbf16, #tpu.memory_space<vmem>>, %arg2: memref<8x128xbf16, #tpu.memory_space<vmem>>, %arg3: memref<8x8xbf16, #tpu.memory_space<vmem>>, %arg4: memref<8x8xbf16, #tpu.memory_space<vmem>>, %arg5: memref<8x1xf32, #tpu.memory_space<vmem>>, %arg6: memref<8x8xf32, #tpu.memory_space<vmem>>, %arg7: memref<8x1xf32, #tpu.memory_space<vmem>>, %arg8: memref<8x8xf32, #tpu.memory_space<vmem>>, %arg9: memref<8x1xf32, #tpu.memory_space<vmem>>, %arg10: memref<8x128xbf16, #tpu.memory_space<vmem>>) attributes {dimension_semantics = [#tpu.dimension_semantics<parallel>], iteration_bounds = array<i64: 8>, scalar_prefetch = 0 : i64, scratch_operands = 0 : i64, tpu.core_type = #tpu.core_type<tc>, window_params = [{transform_indices = @transform_0, window_bounds = array<i64: 1, 8, 4096>}, {transform_indices = @transform_1, window_bounds = array<i64: 8, 128>}, {pipeline_mode = #tpu.pipeline_mode<synchronous>, transform_indices = @transform_2, window_bounds = array<i64: 8, 8>}, {pipeline_mode = #tpu.pipeline_mode<synchronous>, transform_indices = @transform_3, window_bounds = array<i64: 8, 8>}, {pipeline_mode = #tpu.pipeline_mode<synchronous>, transform_indices = @transform_4, window_bounds = array<i64: 8, 1>}, {pipeline_mode = #tpu.pipeline_mode<synchronous>, transform_indices = @transform_5, window_bounds = array<i64: 8, 8>}, {pipeline_mode = #tpu.pipeline_mode<synchronous>, transform_indices = @transform_6, window_bounds = array<i64: 8, 1>}, {pipeline_mode = #tpu.pipeline_mode<synchronous>, transform_indices = @transform_7, window_bounds = array<i64: 8, 8>}, {pipeline_mode = #tpu.pipeline_mode<synchronous>, transform_indices = @transform_8, window_bounds = array<i64: 8, 1>}, {transform_indices = @transform_9, window_bounds = array<i64: 8, 128>}]} {
    %c0 = arith.constant 0 : index
    %c0_0 = arith.constant 0 : index
    %c0_1 = arith.constant 0 : index
    %0 = vector.load %arg1[%c0, %c0_0, %c0_1] : memref<1x8x4096xbf16, #tpu.memory_space<vmem>>, vector<1x8x4096xbf16>
    %1 = vector.shape_cast %0 : vector<1x8x4096xbf16> to vector<8x4096xbf16>
    %c0_2 = arith.constant 0 : index
    %c0_3 = arith.constant 0 : index
    %2 = vector.load %arg3[%c0_2, %c0_3] : memref<8x8xbf16, #tpu.memory_space<vmem>>, vector<8x8xbf16>
    %cst = arith.constant dense<0.000000e+00> : vector<8x4096xf32>
    %3 = tpu.matmul %2, %1, %cst {dimension_numbers = #tpu.dot_dimension_numbers<[1], [0], [0], [1], [0, 0, 1, 1], [], []>} : vector<8x8xbf16>, vector<8x4096xbf16>, vector<8x4096xf32> -> vector<8x4096xf32>
    %c0_4 = arith.constant 0 : index
    %c0_5 = arith.constant 0 : index
    %4 = vector.load %arg4[%c0_4, %c0_5] : memref<8x8xbf16, #tpu.memory_space<vmem>>, vector<8x8xbf16>
    %c0_6 = arith.constant 0 : index
    %c0_7 = arith.constant 0 : index
    %5 = vector.load %arg2[%c0_6, %c0_7] : memref<8x128xbf16, #tpu.memory_space<vmem>>, vector<8x128xbf16>
    %cst_8 = arith.constant dense<0.000000e+00> : vector<8x128xf32>
    %6 = tpu.matmul %4, %5, %cst_8 {dimension_numbers = #tpu.dot_dimension_numbers<[1], [0], [0], [1], [0, 0, 1, 1], [], []>} : vector<8x8xbf16>, vector<8x128xbf16>, vector<8x128xf32> -> vector<8x128xf32>
    %c0_9 = arith.constant 0 : index
    %c0_10 = arith.constant 0 : index
    %7 = vector.load %arg5[%c0_9, %c0_10] : memref<8x1xf32, #tpu.memory_space<vmem>>, vector<8x1xf32>
    %8 = vector.broadcast %7 : vector<8x1xf32> to vector<8x128xf32>
    %9 = arith.addf %6, %8 : vector<8x128xf32>
    %10 = tpu.concatenate %9, %9, %9, %9, %9, %9, %9, %9, %9, %9, %9, %9, %9, %9, %9, %9, %9, %9, %9, %9, %9, %9, %9, %9, %9, %9, %9, %9, %9, %9, %9, %9 in 1 : vector<8x128xf32>, vector<8x128xf32>, vector<8x128xf32>, vector<8x128xf32>, vector<8x128xf32>, vector<8x128xf32>, vector<8x128xf32>, vector<8x128xf32>, vector<8x128xf32>, vector<8x128xf32>, vector<8x128xf32>, vector<8x128xf32>, vector<8x128xf32>, vector<8x128xf32>, vector<8x128xf32>, vector<8x128xf32>, vector<8x128xf32>, vector<8x128xf32>, vector<8x128xf32>, vector<8x128xf32>, vector<8x128xf32>, vector<8x128xf32>, vector<8x128xf32>, vector<8x128xf32>, vector<8x128xf32>, vector<8x128xf32>, vector<8x128xf32>, vector<8x128xf32>, vector<8x128xf32>, vector<8x128xf32>, vector<8x128xf32>, vector<8x128xf32> -> vector<8x4096xf32>
    %11 = arith.addf %3, %10 : vector<8x4096xf32>
    %cst_11 = arith.constant 0.00999999977 : f32
    %12 = vector.broadcast %cst_11 : f32 to vector<8x4096xf32>
    %13 = arith.mulf %12, %11 : vector<8x4096xf32>
    %14 = arith.maximumf %11, %13 : vector<8x4096xf32>
    %c0_12 = arith.constant 0 : index
    %c0_13 = arith.constant 0 : index
    %15 = vector.load %arg6[%c0_12, %c0_13] : memref<8x8xf32, #tpu.memory_space<vmem>>, vector<8x8xf32>
    %cst_14 = arith.constant dense<0.000000e+00> : vector<8x4096xf32>
    %16 = tpu.matmul %15, %14, %cst_14 {dimension_numbers = #tpu.dot_dimension_numbers<[1], [0], [0], [1], [0, 0, 1, 1], [], []>} : vector<8x8xf32>, vector<8x4096xf32>, vector<8x4096xf32> -> vector<8x4096xf32>
    %c0_15 = arith.constant 0 : index
    %c0_16 = arith.constant 0 : index
    %17 = vector.load %arg7[%c0_15, %c0_16] : memref<8x1xf32, #tpu.memory_space<vmem>>, vector<8x1xf32>
    %18 = vector.broadcast %17 : vector<8x1xf32> to vector<8x4096xf32>
    %19 = arith.addf %16, %18 : vector<8x4096xf32>
    %cst_17 = arith.constant 0.00999999977 : f32
    %20 = vector.broadcast %cst_17 : f32 to vector<8x4096xf32>
    %21 = arith.mulf %20, %19 : vector<8x4096xf32>
    %22 = arith.maximumf %19, %21 : vector<8x4096xf32>
    %c0_18 = arith.constant 0 : index
    %c0_19 = arith.constant 0 : index
    %23 = vector.load %arg8[%c0_18, %c0_19] : memref<8x8xf32, #tpu.memory_space<vmem>>, vector<8x8xf32>
    %cst_20 = arith.constant dense<0.000000e+00> : vector<8x4096xf32>
    %24 = tpu.matmul %23, %22, %cst_20 {dimension_numbers = #tpu.dot_dimension_numbers<[1], [0], [0], [1], [0, 0, 1, 1], [], []>} : vector<8x8xf32>, vector<8x4096xf32>, vector<8x4096xf32> -> vector<8x4096xf32>
    %c0_21 = arith.constant 0 : index
    %c0_22 = arith.constant 0 : index
    %25 = vector.load %arg9[%c0_21, %c0_22] : memref<8x1xf32, #tpu.memory_space<vmem>>, vector<8x1xf32>
    %26 = vector.broadcast %25 : vector<8x1xf32> to vector<8x4096xf32>
    %27 = arith.addf %24, %26 : vector<8x4096xf32>
    %cst_23 = arith.constant 0.00999999977 : f32
    %28 = vector.broadcast %cst_23 : f32 to vector<8x4096xf32>
    %29 = arith.mulf %28, %27 : vector<8x4096xf32>
    %30 = arith.maximumf %27, %29 : vector<8x4096xf32>
    %31 = vector.extract_strided_slice %30 {offsets = [0, 0], sizes = [8, 128], strides = [1, 1]} : vector<8x4096xf32> to vector<8x128xf32>
    %32 = vector.extract_strided_slice %30 {offsets = [0, 128], sizes = [8, 128], strides = [1, 1]} : vector<8x4096xf32> to vector<8x128xf32>
    %33 = vector.extract_strided_slice %30 {offsets = [0, 256], sizes = [8, 128], strides = [1, 1]} : vector<8x4096xf32> to vector<8x128xf32>
    %34 = vector.extract_strided_slice %30 {offsets = [0, 384], sizes = [8, 128], strides = [1, 1]} : vector<8x4096xf32> to vector<8x128xf32>
    %35 = vector.extract_strided_slice %30 {offsets = [0, 512], sizes = [8, 128], strides = [1, 1]} : vector<8x4096xf32> to vector<8x128xf32>
    %36 = vector.extract_strided_slice %30 {offsets = [0, 640], sizes = [8, 128], strides = [1, 1]} : vector<8x4096xf32> to vector<8x128xf32>
    %37 = vector.extract_strided_slice %30 {offsets = [0, 768], sizes = [8, 128], strides = [1, 1]} : vector<8x4096xf32> to vector<8x128xf32>
    %38 = vector.extract_strided_slice %30 {offsets = [0, 896], sizes = [8, 128], strides = [1, 1]} : vector<8x4096xf32> to vector<8x128xf32>
    %39 = vector.extract_strided_slice %30 {offsets = [0, 1024], sizes = [8, 128], strides = [1, 1]} : vector<8x4096xf32> to vector<8x128xf32>
    %40 = vector.extract_strided_slice %30 {offsets = [0, 1152], sizes = [8, 128], strides = [1, 1]} : vector<8x4096xf32> to vector<8x128xf32>
    %41 = vector.extract_strided_slice %30 {offsets = [0, 1280], sizes = [8, 128], strides = [1, 1]} : vector<8x4096xf32> to vector<8x128xf32>
    %42 = vector.extract_strided_slice %30 {offsets = [0, 1408], sizes = [8, 128], strides = [1, 1]} : vector<8x4096xf32> to vector<8x128xf32>
    %43 = vector.extract_strided_slice %30 {offsets = [0, 1536], sizes = [8, 128], strides = [1, 1]} : vector<8x4096xf32> to vector<8x128xf32>
    %44 = vector.extract_strided_slice %30 {offsets = [0, 1664], sizes = [8, 128], strides = [1, 1]} : vector<8x4096xf32> to vector<8x128xf32>
    %45 = vector.extract_strided_slice %30 {offsets = [0, 1792], sizes = [8, 128], strides = [1, 1]} : vector<8x4096xf32> to vector<8x128xf32>
    %46 = vector.extract_strided_slice %30 {offsets = [0, 1920], sizes = [8, 128], strides = [1, 1]} : vector<8x4096xf32> to vector<8x128xf32>
    %47 = vector.extract_strided_slice %30 {offsets = [0, 2048], sizes = [8, 128], strides = [1, 1]} : vector<8x4096xf32> to vector<8x128xf32>
    %48 = vector.extract_strided_slice %30 {offsets = [0, 2176], sizes = [8, 128], strides = [1, 1]} : vector<8x4096xf32> to vector<8x128xf32>
    %49 = vector.extract_strided_slice %30 {offsets = [0, 2304], sizes = [8, 128], strides = [1, 1]} : vector<8x4096xf32> to vector<8x128xf32>
    %50 = vector.extract_strided_slice %30 {offsets = [0, 2432], sizes = [8, 128], strides = [1, 1]} : vector<8x4096xf32> to vector<8x128xf32>
    %51 = vector.extract_strided_slice %30 {offsets = [0, 2560], sizes = [8, 128], strides = [1, 1]} : vector<8x4096xf32> to vector<8x128xf32>
    %52 = vector.extract_strided_slice %30 {offsets = [0, 2688], sizes = [8, 128], strides = [1, 1]} : vector<8x4096xf32> to vector<8x128xf32>
    %53 = vector.extract_strided_slice %30 {offsets = [0, 2816], sizes = [8, 128], strides = [1, 1]} : vector<8x4096xf32> to vector<8x128xf32>
    %54 = vector.extract_strided_slice %30 {offsets = [0, 2944], sizes = [8, 128], strides = [1, 1]} : vector<8x4096xf32> to vector<8x128xf32>
    %55 = vector.extract_strided_slice %30 {offsets = [0, 3072], sizes = [8, 128], strides = [1, 1]} : vector<8x4096xf32> to vector<8x128xf32>
    %56 = vector.extract_strided_slice %30 {offsets = [0, 3200], sizes = [8, 128], strides = [1, 1]} : vector<8x4096xf32> to vector<8x128xf32>
    %57 = vector.extract_strided_slice %30 {offsets = [0, 3328], sizes = [8, 128], strides = [1, 1]} : vector<8x4096xf32> to vector<8x128xf32>
    %58 = vector.extract_strided_slice %30 {offsets = [0, 3456], sizes = [8, 128], strides = [1, 1]} : vector<8x4096xf32> to vector<8x128xf32>
    %59 = vector.extract_strided_slice %30 {offsets = [0, 3584], sizes = [8, 128], strides = [1, 1]} : vector<8x4096xf32> to vector<8x128xf32>
    %60 = vector.extract_strided_slice %30 {offsets = [0, 3712], sizes = [8, 128], strides = [1, 1]} : vector<8x4096xf32> to vector<8x128xf32>
    %61 = vector.extract_strided_slice %30 {offsets = [0, 3840], sizes = [8, 128], strides = [1, 1]} : vector<8x4096xf32> to vector<8x128xf32>
    %62 = vector.extract_strided_slice %30 {offsets = [0, 3968], sizes = [8, 128], strides = [1, 1]} : vector<8x4096xf32> to vector<8x128xf32>
    %63 = arith.maximumf %31, %32 : vector<8x128xf32>
    %64 = arith.maximumf %33, %34 : vector<8x128xf32>
    %65 = arith.maximumf %35, %36 : vector<8x128xf32>
    %66 = arith.maximumf %37, %38 : vector<8x128xf32>
    %67 = arith.maximumf %39, %40 : vector<8x128xf32>
    %68 = arith.maximumf %41, %42 : vector<8x128xf32>
    %69 = arith.maximumf %43, %44 : vector<8x128xf32>
    %70 = arith.maximumf %45, %46 : vector<8x128xf32>
    %71 = arith.maximumf %47, %48 : vector<8x128xf32>
    %72 = arith.maximumf %49, %50 : vector<8x128xf32>
    %73 = arith.maximumf %51, %52 : vector<8x128xf32>
    %74 = arith.maximumf %53, %54 : vector<8x128xf32>
    %75 = arith.maximumf %55, %56 : vector<8x128xf32>
    %76 = arith.maximumf %57, %58 : vector<8x128xf32>
    %77 = arith.maximumf %59, %60 : vector<8x128xf32>
    %78 = arith.maximumf %61, %62 : vector<8x128xf32>
    %79 = arith.maximumf %63, %64 : vector<8x128xf32>
    %80 = arith.maximumf %65, %66 : vector<8x128xf32>
    %81 = arith.maximumf %67, %68 : vector<8x128xf32>
    %82 = arith.maximumf %69, %70 : vector<8x128xf32>
    %83 = arith.maximumf %71, %72 : vector<8x128xf32>
    %84 = arith.maximumf %73, %74 : vector<8x128xf32>
    %85 = arith.maximumf %75, %76 : vector<8x128xf32>
    %86 = arith.maximumf %77, %78 : vector<8x128xf32>
    %87 = arith.maximumf %79, %80 : vector<8x128xf32>
    %88 = arith.maximumf %81, %82 : vector<8x128xf32>
    %89 = arith.maximumf %83, %84 : vector<8x128xf32>
    %90 = arith.maximumf %85, %86 : vector<8x128xf32>
    %91 = arith.maximumf %87, %88 : vector<8x128xf32>
    %92 = arith.maximumf %89, %90 : vector<8x128xf32>
    %93 = arith.maximumf %91, %92 : vector<8x128xf32>
    %94 = arith.truncf %93 : vector<8x128xf32> to vector<8x128xbf16>
    %c0_24 = arith.constant 0 : index
    %c0_25 = arith.constant 0 : index
    %95 = vector.load %arg10[%c0_24, %c0_25] : memref<8x128xbf16, #tpu.memory_space<vmem>>, vector<8x128xbf16>
    tpu.vector_store %arg10[%c0_24, %c0_25], %94 {strides = array<i32>} : memref<8x128xbf16, #tpu.memory_space<vmem>>, vector<8x128xbf16>,
    return
  }
  func.func @transform_0(%arg0: i32) -> (i32, i32, i32) {
    %c0_i32 = arith.constant 0 : i32
    %c0_i32_0 = arith.constant 0 : i32
    %c0_i32_1 = arith.constant 0 : i32
    return %arg0, %c0_i32, %c0_i32_0 : i32, i32, i32
  }
  func.func @transform_1(%arg0: i32) -> (i32, i32) {
    %c0_i32 = arith.constant 0 : i32
    %c0_i32_0 = arith.constant 0 : i32
    return %c0_i32, %arg0 : i32, i32
  }
  func.func @transform_2(%arg0: i32) -> (i32, i32) {
    %c0_i32 = arith.constant 0 : i32
    %c0_i32_0 = arith.constant 0 : i32
    %c0_i32_1 = arith.constant 0 : i32
    return %c0_i32, %c0_i32_0 : i32, i32
  }
  func.func @transform_3(%arg0: i32) -> (i32, i32) {
    %c0_i32 = arith.constant 0 : i32
    %c0_i32_0 = arith.constant 0 : i32
    %c0_i32_1 = arith.constant 0 : i32
    return %c0_i32, %c0_i32_0 : i32, i32
  }
  func.func @transform_4(%arg0: i32) -> (i32, i32) {
    %c0_i32 = arith.constant 0 : i32
    %c0_i32_0 = arith.constant 0 : i32
    %c0_i32_1 = arith.constant 0 : i32
    return %c0_i32, %c0_i32_0 : i32, i32
  }
  func.func @transform_5(%arg0: i32) -> (i32, i32) {
    %c0_i32 = arith.constant 0 : i32
    %c0_i32_0 = arith.constant 0 : i32
    %c0_i32_1 = arith.constant 0 : i32
    return %c0_i32, %c0_i32_0 : i32, i32
  }
  func.func @transform_6(%arg0: i32) -> (i32, i32) {
    %c0_i32 = arith.constant 0 : i32
    %c0_i32_0 = arith.constant 0 : i32
    %c0_i32_1 = arith.constant 0 : i32
    return %c0_i32, %c0_i32_0 : i32, i32
  }
  func.func @transform_7(%arg0: i32) -> (i32, i32) {
    %c0_i32 = arith.constant 0 : i32
    %c0_i32_0 = arith.constant 0 : i32
    %c0_i32_1 = arith.constant 0 : i32
    return %c0_i32, %c0_i32_0 : i32, i32
  }
  func.func @transform_8(%arg0: i32) -> (i32, i32) {
    %c0_i32 = arith.constant 0 : i32
    %c0_i32_0 = arith.constant 0 : i32
    %c0_i32_1 = arith.constant 0 : i32
    return %c0_i32, %c0_i32_0 : i32, i32
  }
  func.func @transform_9(%arg0: i32) -> (i32, i32) {
    %c0_i32 = arith.constant 0 : i32
    %c0_i32_0 = arith.constant 0 : i32
    return %c0_i32, %arg0 : i32, i32
  }
}

</mosaic_0001>

<bundles_post_ra>
// kernel: tpu_custom_call.1
= control target key start
LH: loop header
LB: loop body
LE: loop exit
PB: predicated region body
PF: predicated region fallthrough
CT: control target
= control target key end

     0   :  { %s4858_s0 = inlined_call_operand.hbm [shape: bf16[8,8,4096], index: 0, kind: input, shape index: {}]   ;;  %s4859_s1 = inlined_call_operand.hbm [shape: bf16[8,1024], index: 1, kind: input, shape index: {}]   ;;  %s4860_s2 = inlined_call_operand.vmem [shape: bf16[8,8], index: 2, kind: input, shape index: {}]   ;;  %s4861_s3 = inlined_call_operand.vmem [shape: bf16[8,8], index: 3, kind: input, shape index: {}]   ;;  %s4862_s4 = inlined_call_operand.vmem [shape: f32[8,1], index: 4, kind: input, shape index: {}]   ;;  %s4863_s5 = inlined_call_operand.vmem [shape: f32[8,8], index: 5, kind: input, shape index: {}]   ;;  %s4864_s6 = inlined_call_operand.vmem [shape: f32[8,1], index: 6, kind: input, shape index: {}]   ;;  %s4865_s7 = inlined_call_operand.vmem [shape: f32[8,8], index: 7, kind: input, shape index: {}]   ;;  %s4866_s8 = inlined_call_operand.vmem [shape: f32[8,1], index: 8, kind: input, shape index: {}]   ;;  %s4867_s9 = inlined_call_operand.hbm [shape: bf16[8,1024], index: 9, kind: output, shape index: {}]  }
   0x1   :  { %4871 = sst [smem:[#allocation13_spill]] %s4858_s0 }
   0x2   :  { %14 = vsyncpa [#allocation3], 0 }
   0x3   :  { %16 = vsyncpa [#allocation3 + $0x1], 0 }
   0x4   :  { %17 = vsyncpa [#allocation6], 0 }
   0x5   :  { %19 = vsyncpa [#allocation6 + $0x1], 0 }
   0x6   :  { %20 = vsyncpa [#allocation4], 0 }
   0x7   :  { %22 = vsyncpa [#allocation4 + $0x1], 0  ;;  %s4317_s30 = smov 0   ;;  %s4319_s10 = smov 0  }
   0x8   :  { %s4321_s11 = smov 0   ;;  %s4323_s12 = smov 0  }
   0x9 LB: > { %4872 = sst [smem:[#allocation11_spill]] %s4255_s11  ;;  %s4338_s13 = sadd.s32 4294967295, %s4259_s12   ;;  %s4259_s12 = sphi %s4323_s12, %s4891_s12   ;;  %s4255_s11 = sphi %s4321_s11, %s4888_s11   ;;  %s4251_s10 = sphi %s4319_s10, %s4890_s10   ;;  %s4247_s30 = sphi %s4317_s30, %s4889_s30  }
   0xa   : > { %s3919_s14 = sadd.s32 4294967294, %s4259_s12   ;;  %s4342_s15 = sadd.s32 1, %s4259_s12  }
   0xb   : > { %s35_s16 = sadd.s32 1, %s4255_s11  ;;  %s32_s17 = ssub.s32 %s4259_s12, %s4342_s15 }
   0xc   : > { %p42_p0 = scmp.ne.s32.totalorder %s4255_s11, %s4251_s10  ;;  %p33_p1 = scmp.eq.s32.totalorder %s32_s17, 0 }
   0xd   : > { %p43_p2 = scmp.eq.s32.totalorder %s4259_s12, 0  ;;  %p48_p3 = scmp.ne.s32.totalorder %s4251_s10, %s4247_s30 }
   0xe   : > { %p49_p4 = scmp.eq.s32.totalorder %s4338_s13, 0  ;;  %p245_p7 = scmp.eq.s32.totalorder %s4338_s13, 7 }
   0xf   : > { %s4354_s18 = scalar_select %p33_p1, %s4255_s11, %s35_s16  }
  0x10   : > { %p4356_p5 = por %p43_p2, %p42_p0  ;;  %p4360_p6 = por %p49_p4, %p48_p3 }
  0x11   : > { %4873 = sst [smem:[#allocation12_spill]] %s4354_s18  ;;  %p251_p8 = scmp.eq.s32.totalorder %s3919_s14, 7 }
  0x12   : > { %s4875_s20 = scalar_select %p4360_p6, 1, 0 }
  0x13   : > { %p4058_p9 = scmp.lt.s32.totalorder %s4259_s12, 8  ;;  %p4366_p10 = por %p245_p7, %p42_p0 }
  0x14   : > { %p4370_p11 = por %p251_p8, %p48_p3  ;;  %s4375_s23 = sand.u32 1, %s4255_s11  }
  0x15   : > { %s4876_s21 = scalar_select %p4366_p10, 1, 0 }
  0x16   : > { %s4877_s22 = scalar_select %p4370_p11, 1, 0 }
  0x17   : > { %s4032_s24 = sshll.u32 %s4259_s12, 11  ;;  %s3922_s25 = sshll.u32 %s4375_s23, 7 }
  0x18   : > { %s4878_s0 = sld [smem:[#allocation13_spill]]  ;;  %s296_s29 = scalar_lea.vmem [#allocation2], %s3922_s25 }
  0x19   : > { %s304_s14 = sshll.u32 %s296_s29, 4  ;;  %p4386_p12 = pnand %p4058_p9, %p4356_p5  ;;  %s4390_s14 = int_to_ptr.vmem [resolvable:$true] %s304_s14 }
  0x1a   : > { %s293_s17 = scalar_lea.sflag [#allocation3], %s4375_s23 }
  0x1b   : > { %p4131_p2 = pneg %p4386_p12 }
  0x1e   : > { %s4382_s28 = scalar_lea.hbm %s4878_s0, %s4032_s24  ;;  %s4134_s26 = scalar_lea.hbm %s4878_s0, 16384 }
  0x1f   : > { %s4129_s24 = scalar_lea.hbm %s4382_s28, 2048  ;;  %p4135_p5 = scmp.lt.u32.totalorder %s4382_s28, %s4878_s0 }
  0x20   : > { %p4130_p1 = scmp.ne.s32.totalorder %s4382_s28, %s4129_s24  ;;  %p4136_p7 = scmp.lt.u32.totalorder %s4134_s26, %s4129_s24 }
  0x21   : > { %p4138_p9 = scmp.lt.u32.totalorder %s4129_s24, %s4382_s28 }
  0x22   : > { %p4132_p3 = pnand %p4131_p2, %p4130_p1  ;;  %p4137_p8 = por %p4136_p7, %p4135_p5 }
  0x24   : > { %p4133_p4 = pneg %p4132_p3  ;;  %p4139_p13 = por %p4138_p9, %p4137_p8 }
  0x26   : > { %p4140_p0 = pnand %p4139_p13, %p4133_p4 }
  0x28   : > { %4143 = shalt.err (!%p4140_p0)
}
  0x29   : > { %s4144_s18 = scalar_lea.vmem %s4390_s14, 2048  ;;  %s4261_s19 = smov [#allocation2]  }
  0x2a   : > { %p4145_p1 = scmp.ne.s32.totalorder %s4390_s14, %s4144_s18  ;;  %s4149_s25 = sshll.u32 %s4261_s19, 4  ;;  %s4150_s25 = int_to_ptr.vmem [resolvable:$false] %s4149_s25 }
  0x2b   : > { %s4151_s27 = scalar_lea.vmem %s4150_s25, 4096  ;;  %p4152_p10 = scmp.lt.s32.totalorder %s4390_s14, %s4150_s25 }
  0x2c   : > { %p4147_p3 = pnand %p4145_p1, %p4131_p2  ;;  %p4153_p5 = scmp.lt.s32.totalorder %s4151_s27, %s4144_s18 }
  0x2e   : > { %p4148_p11 = pneg %p4147_p3  ;;  %p4154_p7 = por %p4153_p5, %p4152_p10 }
  0x30   : > { %p4155_p8 = pnand %p4154_p7, %p4148_p11 }
  0x32   : > { %4158 = shalt.err (!%p4155_p8)
}
  0x33   : > { %4050 = dma.hbm_to_vmem [thread:$0]  (!%p4386_p12), %s4382_s28, 2048, %s4390_s14, %s293_s17  }
  0x34   : > { %p4880_p13 = scmp.lt.s32.totalorder %s4259_s12, 9  ;;  %p4881_p0 = scmp.ge.s32.totalorder %s4259_s12, 1 }
  0x35   : > { %s3925_s18 = sshll.u32 %s4375_s23, 2  ;;  %s3926_s26 = sshll.u32 %s4259_s12, 6 }
  0x36   : > { %p4424_p4 = pnand %p4881_p0, %p4880_p13  ;;  %s4433_s25 = scalar_lea.hbm %s4859_s1, %s3926_s26 }
  0x37   : > { %s315_s27 = scalar_lea.vmem [#allocation5], %s3925_s18  ;;  %s312_s28 = scalar_lea.sflag [#allocation6], %s4375_s23 }
  0x38   : > { %s4882_s24 = scalar_select %p4424_p4, 1, 0 }
  0x39   : > { %s322_s0 = sshll.u32 %s315_s27, 4  ;;  %s4159_s14 = scalar_lea.hbm %s4433_s25, 64  ;;  %s323_s0 = int_to_ptr.vmem [resolvable:$true] %s322_s0 }
  0x3a   : > { %p4160_p10 = scmp.ne.s32.totalorder %s4433_s25, %s4159_s14  ;;  %s4164_s29 = scalar_lea.hbm %s4859_s1, 512 }
  0x3b   : > { %p4165_p1 = scmp.lt.u32.totalorder %s4433_s25, %s4859_s1  ;;  %p4166_p3 = scmp.lt.u32.totalorder %s4164_s29, %s4159_s14 }
  0x3c   : > { %p4162_p11 = pnand %p4160_p10, %p4131_p2  ;;  %p4168_p7 = scmp.lt.u32.totalorder %s4159_s14, %s4433_s25 }
  0x3d   : > { %p4167_p5 = por %p4166_p3, %p4165_p1 }
  0x3e   : > { %p4163_p9 = pneg %p4162_p11 }
  0x3f   : > { %p4169_p8 = por %p4168_p7, %p4167_p5 }
  0x41   : > { %p4170_p13 = pnand %p4169_p8, %p4163_p9 }
  0x43   : > { %4173 = shalt.err (!%p4170_p13)
}
  0x44   : > { %s4174_s23 = scalar_lea.vmem %s323_s0, 64  ;;  %s4262_s18 = smov [#allocation5]  }
  0x45   : > { %p4175_p0 = scmp.ne.s32.totalorder %s323_s0, %s4174_s23  ;;  %s4179_s11 = sshll.u32 %s4262_s18, 4  ;;  %s4180_s11 = int_to_ptr.vmem [resolvable:$false] %s4179_s11 }
  0x46   : > { %s4181_s27 = scalar_lea.vmem %s4180_s11, 128  ;;  %p4182_p6 = scmp.lt.s32.totalorder %s323_s0, %s4180_s11 }
  0x47   : > { %p4177_p10 = pnand %p4175_p0, %p4131_p2  ;;  %p4183_p4 = scmp.lt.s32.totalorder %s4181_s27, %s4174_s23 }
  0x49   : > { %p4178_p11 = pneg %p4177_p10  ;;  %p4184_p1 = por %p4183_p4, %p4182_p6 }
  0x4b   : > { %p4185_p3 = pnand %p4184_p1, %p4178_p11 }
  0x4d   : > { %4188 = shalt.err (!%p4185_p3)
}
  0x4e   : > { %4053 = dma.hbm_to_vmem [thread:$0]  (!%p4386_p12), %s4433_s25, 64, %s323_s0, %s312_s28  }
  0x4f   : > { %p4883_p9 = scmp.ne.s32.totalorder %s4882_s24, 0 }
  0x50   : > { %s4458_s14 = sand.u32 (!%p4883_p9), 1, %s4251_s10   ;;  %p4884_p6 = scmp.ne.s32.totalorder (!%p4883_p9), %s4875_s20, 0 }
  0x51   : > { %331 = sbr.rel (%p4883_p9) target bundleno = 849 (0x351), region = 56  ;;  %s3928_s17 = sshll.u32 (!%p4883_p9), %s4458_s14, 7 }
  0x52   : > { %s334_s29 = scalar_lea.sflag (!%p4883_p9), [#allocation3], %s4458_s14  ;;  %s4462_s26 = scalar_lea.vmem (!%p4883_p9), [#allocation2], %s3928_s17 }
  0x58   : > { %4234 = dma.done.wait (%p4884_p6), %s334_s29, 2048  }
  0x59   : > { %4236 = vsyncadd (%p4884_p6), %s334_s29, 4294965248  ;;  %s3929_s0 = sshll.u32 %s4458_s14, 2  ;;  %s343_s16 = scalar_lea.sflag [#allocation6], %s4458_s14 }
  0x5a   : > { %s346_s24 = scalar_lea.vmem [#allocation5], %s3929_s0 }
  0x5b   : > { %4238 = dma.done.wait (%p4884_p6), %s343_s16, 64  }
  0x5c   : > { %4240 = vsyncadd (%p4884_p6), %s343_s16, 4294967232  ;;  %v4263_v0 = vmov 0.0   ;;  %vm4264_vm0 = vmmov 0   ;;  %v4265_v1 = vmov 0   ;;  %vm416_vm1 = vcmask 1043456   ;;  %v387_v3 = vld [vmem:[%s4462_s26] sm:$0xff] }
  0x5d   : > { %4035 = vmatprep.subr.bf16.mxu0 %v4263_v0  ;;  %4037 = vmatprep.mubr.msk.bf16.mxu0 %vm4264_vm0, %v4263_v0  ;;  %v405_v2 = vld [vmem:[%s346_s24] sm:$0xf]  ;;  %v3933_v5 = vcombine.high %v387_v3, %v387_v3  ;;  %v3932_v6 = vcombine.low %v387_v3, %v387_v3  ;;  %vm412_vm2 = vcmask 64512   ;;  %v388_v7 = vld [vmem:[%s4462_s26 + $0x8] sm:$0xff]  ;;  %v389_v8 = vld [vmem:[%s4462_s26 + $0x10] sm:$0xff]  ;;  %s4029_s25 = sshll.u32 %s4338_s13, 6 }
  0x5e   : > { %671 = vmatprep.mubr.bf16.mxu1 %v4265_v1  ;;  %4095 = vset.pattern.permute.xlu0 %v4265_v1  ;;  %v418_v4 = vsel %vm416_vm1, %v405_v2, 0  ;;  %v404_v9 = vld [vmem:[%s4861_s3] sm:$0xf]  ;;  %v3935_v10 = vcombine.high %v388_v7, %v388_v7  ;;  %v3934_v11 = vcombine.low %v388_v7, %v388_v7  ;;  %v3937_v12 = vcombine.high %v389_v8, %v389_v8  ;;  %v390_v14 = vld [vmem:[%s4462_s26 + $0x18] sm:$0xff]  ;;  %v392_v24 = vld [vmem:[%s4462_s26 + $0x28] sm:$0xff]  ;;  %s385_s28 = scalar_lea.vmem [#allocation7], %s3929_s0  ;;  %s4815_s11 = scalar_lea.hbm %s4867_s9, %s4029_s25 }
  0x5f   : > { %4096 = vset.pattern.permute.xlu1 %v4265_v1  ;;  %4036 = vmatpush3.bf16.msra.mxu0 %v418_v4  ;;  %v3936_v13 = vcombine.low %v389_v8, %v389_v8  ;;  %v391_v15 = vld [vmem:[%s4462_s26 + $0x20] sm:$0xff]  ;;  %v544_v16 = vsel %vm416_vm1, %v3932_v6, 0  ;;  %v3939_v17 = vcombine.high %v390_v14, %v390_v14  ;;  %v3938_v23 = vcombine.low %v390_v14, %v390_v14  ;;  %v393_v26 = vld [vmem:[%s4462_s26 + $0x30] sm:$0xff]  ;;  %v394_v33 = vld [vmem:[%s4462_s26 + $0x38] sm:$0xff]  ;;  %s3826_s19 = sshll.u32 %s385_s28, 4  ;;  %s3813_s27 = scalar_lea.sflag [#allocation4], %s4458_s14  ;;  %s4817_s19 = int_to_ptr.vmem [resolvable:$true] %s3826_s19 }
  0x60   : > { %3964 = vmatprep.subr.msk.bf16.mxu1 %vm416_vm1, %v3933_v5  ;;  %v4495_v18 = vld [vmem:[%s4860_s2] sm:$0xf]  ;;  %3966 = vmatprep.subr.msk.bf16.mxu0 %vm416_vm1, %v3935_v10  ;;  %v550_v19 = vsel %vm416_vm1, %v3934_v11, 0  ;;  %v3941_v21 = vcombine.high %v391_v15, %v391_v15  ;;  %v3940_v25 = vcombine.low %v391_v15, %v391_v15  ;;  %v3943_v29 = vcombine.high %v392_v24, %v392_v24  ;;  %v396_v41 = vld [vmem:[%s4462_s26 + $0x48] sm:$0xff]  ;;  %v397_v43 = vld [vmem:[%s4462_s26 + $0x50] sm:$0xff]  ;;  %s4189_s17 = scalar_lea.vmem %s4817_s19, 64 }
  0x61   : > { %640 = vmatpush1.bf16.msra.mxu1 %v544_v16  ;;  %v556_v20 = vsel %vm416_vm1, %v3936_v13, 0  ;;  %v406_v22 = vld [vmem:[%s4862_s4] sm:$0xff]  ;;  %v562_v28 = vsel %vm416_vm1, %v3938_v23, 0  ;;  %v3945_v31 = vcombine.high %v393_v26, %v393_v26  ;;  %v3942_v32 = vcombine.low %v392_v24, %v392_v24  ;;  %v398_v49 = vld [vmem:[%s4462_s26 + $0x58] sm:$0xff]  ;;  %v400_v57 = vld [vmem:[%s4462_s26 + $0x68] sm:$0xff]  ;;  %p4190_p12 = scmp.ne.s32.totalorder %s4817_s19, %s4189_s17  ;;  %p4885_p2 = scmp.ne.s32.totalorder %s4876_s21, 0 }
  0x62   : > { %4038 = vmatmul.mubr.msk.bf16.vlgmr.msra.gmra.mrb[0].mxu0 %vm412_vm2, %v404_v9  ;;  %3968 = vmatprep.subr.msk.bf16.mxu1 %vm416_vm1, %v3937_v12  ;;  %v1360_v27 = vld [vmem:[%s4864_s6] sm:$0xff]  ;;  %v568_v30 = vsel %vm416_vm1, %v3940_v25, 0  ;;  %v3944_v34 = vcombine.low %v393_v26, %v393_v26  ;;  %v3947_v37 = vcombine.high %v394_v33, %v394_v33  ;;  %v3946_v40 = vcombine.low %v394_v33, %v394_v33  ;;  %v401_v59 = vld [vmem:[%s4462_s26 + $0x70] sm:$0xff]  ;;  %v402_v3 = vld [vmem:[%s4462_s26 + $0x78] sm:$0xff]  ;;  %s4266_s13 = smov [#allocation7]  }
  0x63   : > { %681 = vmatpush1.bf16.msra.mxu0 %v550_v19  ;;  %712 = vmatprep.mubr.bf16.mxu0 %v4265_v1  ;;  %v395_v35 = vld [vmem:[%s4462_s26 + $0x40] sm:$0xff]  ;;  %v574_v36 = vsel %vm416_vm1, %v3942_v32, 0  ;;  %v3951_v45 = vcombine.high %v396_v41, %v396_v41  ;;  %v3953_v47 = vcombine.high %v397_v43, %v397_v43  ;;  %v3950_v48 = vcombine.low %v396_v41, %v396_v41  ;;  %p4191_p4 = pnand %p4190_p12, %p4885_p2  ;;  %s4193_s0 = sshll.u32 %s4266_s13, 4  ;;  %s4194_s0 = int_to_ptr.vmem [resolvable:$false] %s4193_s0 }
  0x64   : > { %3965 = vmatmul.mubr.msk.bf16.vlgmr.msra.gmra.mrb[0].mxu1 %vm412_vm2, %v4495_v18  ;;  %3970 = vmatprep.subr.msk.bf16.mxu0 %vm416_vm1, %v3939_v17  ;;  %v580_v38 = vsel %vm416_vm1, %v3944_v34, 0  ;;  %v3949_v39 = vcombine.high %v395_v35, %v395_v35  ;;  %v3948_v42 = vcombine.low %v395_v35, %v395_v35  ;;  %v586_v44 = vsel %vm416_vm1, %v3946_v40, 0  ;;  %v399_v51 = vld [vmem:[%s4462_s26 + $0x60] sm:$0xff]  ;;  %s4195_s29 = scalar_lea.vmem %s4194_s0, 128  ;;  %p4196_p7 = scmp.lt.s32.totalorder %s4817_s19, %s4194_s0 }
  0x65   : > { %722 = vmatpush1.bf16.msra.mxu1 %v556_v20  ;;  %753 = vmatprep.mubr.bf16.mxu1 %v4265_v1  ;;  %v3952_v50 = vcombine.low %v397_v43, %v397_v43  ;;  %v598_v52 = vsel %vm416_vm1, %v3950_v48, 0  ;;  %v3955_v53 = vcombine.high %v398_v49, %v398_v49  ;;  %v3957_v55 = vcombine.high %v399_v51, %v399_v51  ;;  %p4192_p5 = pneg %p4191_p4  ;;  %p4197_p8 = scmp.lt.s32.totalorder %s4195_s29, %s4189_s17 }
  0x66   : > { %3972 = vmatprep.subr.msk.bf16.mxu1 %vm416_vm1, %v3941_v21  ;;  %409 = vperm.xlu0 %4095, %v406_v22   ;;  %v592_v46 = vsel %vm416_vm1, %v3948_v42, 0  ;;  %v3954_v56 = vcombine.low %v398_v49, %v398_v49  ;;  %v3956_v58 = vcombine.low %v399_v51, %v399_v51  ;;  %v3959_v61 = vcombine.high %v400_v57, %v400_v57 }
  0x67   : > { %v604_v54 = vsel %vm416_vm1, %v3952_v50, 0  ;;  %v3961_v63 = vcombine.high %v401_v59, %v401_v59  ;;  %v3958_v2 = vcombine.low %v400_v57, %v400_v57  ;;  %v3960_v4 = vcombine.low %v401_v59, %v401_v59  ;;  %p4198_p13 = por %p4197_p8, %p4196_p7 }
  0x68   : > { %v610_v60 = vsel %vm416_vm1, %v3954_v56, 0  ;;  %v616_v62 = vsel %vm416_vm1, %v3956_v58, 0  ;;  %v3963_v6 = vcombine.high %v402_v3, %v402_v3  ;;  %v3962_v8 = vcombine.low %v402_v3, %v402_v3 }
  0x69   : > { %v622_v5 = vsel %vm416_vm1, %v3958_v2, 0  ;;  %v628_v7 = vsel %vm416_vm1, %v3960_v4, 0  ;;  %p4199_p0 = pnand %p4198_p13, %p4192_p5 }
  0x6a   : > { %3967 = vmatmul.mubr.msk.bf16.vlgmr.msra.gmra.mrb[4].mxu0 %vm412_vm2, %v4495_v18  ;;  %1363 = vperm.xlu0 %4095, %v1360_v27   ;;  %v634_v9 = vsel %vm416_vm1, %v3962_v8, 0 }
  0x6b   : > { %763 = vmatpush1.bf16.msra.mxu0 %v562_v28  ;;  %794 = vmatprep.mubr.bf16.mxu0 %v4265_v1  ;;  %v4602_v28 = vld [vmem:[%s4863_s5] sm:$0xff] }
  0x6c   : > { %3969 = vmatmul.mubr.msk.bf16.vlgmr.msra.gmra.mrb[4].mxu1 %vm412_vm2, %v4495_v18  ;;  %3974 = vmatprep.subr.msk.bf16.mxu0 %vm416_vm1, %v3943_v29 }
  0x6d   : > { %804 = vmatpush1.bf16.msra.mxu1 %v568_v30  ;;  %835 = vmatprep.mubr.bf16.mxu1 %v4265_v1 }
  0x6e   : > { %3976 = vmatprep.subr.msk.bf16.mxu1 %vm416_vm1, %v3945_v31 }
  0x72   : > { %3971 = vmatmul.mubr.msk.bf16.vlgmr.msra.gmra.mrb[8].mxu0 %vm412_vm2, %v4495_v18 }
  0x73   : > { %845 = vmatpush1.bf16.msra.mxu0 %v574_v36  ;;  %876 = vmatprep.mubr.bf16.mxu0 %v4265_v1 }
  0x74   : > { %3973 = vmatmul.mubr.msk.bf16.vlgmr.msra.gmra.mrb[8].mxu1 %vm412_vm2, %v4495_v18  ;;  %3978 = vmatprep.subr.msk.bf16.mxu0 %vm416_vm1, %v3947_v37 }
  0x75   : > { %886 = vmatpush1.bf16.msra.mxu1 %v580_v38  ;;  %917 = vmatprep.mubr.bf16.mxu1 %v4265_v1 }
  0x76   : > { %3980 = vmatprep.subr.msk.bf16.mxu1 %vm416_vm1, %v3949_v39 }
  0x7a   : > { %3975 = vmatmul.mubr.msk.bf16.vlgmr.msra.gmra.mrb[12].mxu0 %vm412_vm2, %v4495_v18 }
  0x7b   : > { %927 = vmatpush1.bf16.msra.mxu0 %v586_v44  ;;  %958 = vmatprep.mubr.bf16.mxu0 %v4265_v1 }
  0x7c   : > { %3977 = vmatmul.mubr.msk.bf16.vlgmr.msra.gmra.mrb[12].mxu1 %vm412_vm2, %v4495_v18  ;;  %3982 = vmatprep.subr.msk.bf16.mxu0 %vm416_vm1, %v3951_v45 }
  0x7d   : > { %968 = vmatpush1.bf16.msra.mxu1 %v592_v46  ;;  %999 = vmatprep.mubr.bf16.mxu1 %v4265_v1 }
  0x7e   : > { %3984 = vmatprep.subr.msk.bf16.mxu1 %vm416_vm1, %v3953_v47 }
  0x82   : > { %3979 = vmatmul.mubr.msk.bf16.vlgmr.msra.gmra.mrb[16].mxu0 %vm412_vm2, %v4495_v18 }
  0x83   : > { %1009 = vmatpush1.bf16.msra.mxu0 %v598_v52  ;;  %1040 = vmatprep.mubr.bf16.mxu0 %v4265_v1 }
  0x84   : > { %3981 = vmatmul.mubr.msk.bf16.vlgmr.msra.gmra.mrb[16].mxu1 %vm412_vm2, %v4495_v18  ;;  %3986 = vmatprep.subr.msk.bf16.mxu0 %vm416_vm1, %v3955_v53 }
  0x85   : > { %1050 = vmatpush1.bf16.msra.mxu1 %v604_v54  ;;  %1081 = vmatprep.mubr.bf16.mxu1 %v4265_v1 }
  0x86   : > { %3988 = vmatprep.subr.msk.bf16.mxu1 %vm416_vm1, %v3957_v55 }
  0x8a   : > { %3983 = vmatmul.mubr.msk.bf16.vlgmr.msra.gmra.mrb[20].mxu0 %vm412_vm2, %v4495_v18 }
  0x8b   : > { %1091 = vmatpush1.bf16.msra.mxu0 %v610_v60  ;;  %1122 = vmatprep.mubr.bf16.mxu0 %v4265_v1 }
  0x8c   : > { %3985 = vmatmul.mubr.msk.bf16.vlgmr.msra.gmra.mrb[20].mxu1 %vm412_vm2, %v4495_v18  ;;  %3990 = vmatprep.subr.msk.bf16.mxu0 %vm416_vm1, %v3959_v61 }
  0x8d   : > { %1132 = vmatpush1.bf16.msra.mxu1 %v616_v62  ;;  %1163 = vmatprep.mubr.bf16.mxu1 %v4265_v1 }
  0x8e   : > { %3992 = vmatprep.subr.msk.bf16.mxu1 %vm416_vm1, %v3961_v63 }
  0x92   : > { %3987 = vmatmul.mubr.msk.bf16.vlgmr.msra.gmra.mrb[24].mxu0 %vm412_vm2, %v4495_v18 }
  0x93   : > { %1173 = vmatpush1.bf16.msra.mxu0 %v622_v5  ;;  %1204 = vmatprep.mubr.bf16.mxu0 %v4265_v1 }
  0x94   : > { %3989 = vmatmul.mubr.msk.bf16.vlgmr.msra.gmra.mrb[24].mxu1 %vm412_vm2, %v4495_v18  ;;  %3994 = vmatprep.subr.msk.bf16.mxu0 %vm416_vm1, %v3963_v6 }
  0x95   : > { %1214 = vmatpush1.bf16.msra.mxu1 %v628_v7  ;;  %1245 = vmatprep.mubr.bf16.mxu1 %v4265_v1 }
  0x9a   : > { %3991 = vmatmul.mubr.msk.bf16.vlgmr.msra.gmra.mrb[28].mxu0 %vm412_vm2, %v4495_v18 }
  0x9b   : > { %1255 = vmatpush1.bf16.msra.mxu0 %v634_v9  ;;  %1286 = vmatprep.mubr.bf16.mxu0 %v4265_v1 }
  0x9c   : > { %3993 = vmatmul.mubr.msk.bf16.vlgmr.msra.gmra.mrb[28].mxu1 %vm412_vm2, %v4495_v18 }
  0x9d   : > { %1433 = vmatprep.mubr.f32.mxu1 %v4263_v0 }
  0xa2   : > { %3995 = vmatmul.mubr.msk.bf16.vlgmr.msra.gmra.mrb[32].mxu0 %vm412_vm2, %v4495_v18 }
  0xa3   : > { %1575 = vmatprep.mubr.f32.mxu0 %v4263_v0 }
  0xe5   : > { %v410_v10 = vpop.permute.xlu0 %409 }
 0x135   : > { %v454_v11 = vpop.f32.mrb[0].mxu0 }
 0x136   : > { %v4594_v12 = vadd.f32 %v454_v11, %v410_v10  ;;  %v4039_v13 = vpop.f32.mrb[1].mxu0 }
 0x137   : > { %v457_v14 = vpop.f32.mrb[2].mxu0  ;;  %v673_v15 = vpop.f32.mrb[0].mxu1 }
 0x138   : > { %v674_v16 = vadd.f32 %v673_v15, %v4594_v12  ;;  %v4040_v1 = vpop.f32.mrb[3].mxu0  ;;  %v675_v17 = vpop.f32.mrb[1].mxu1 }
 0x139   : > { %v676_v19 = vadd.f32 %v675_v17, %v4594_v12  ;;  %v677_v20 = vpop.f32.mrb[2].mxu1 }
 0x13a   : > { %v1295_v21 = vmul.f32 0.01, %v674_v16  ;;  %v678_v22 = vpop.f32.mrb[3].mxu1 }
 0x13b   : > { %v1296_v23 = vmul.f32 0.01, %v676_v19 }
 0x13c   : > { %v1327_v25 = vmax.f32 %v674_v16, %v1295_v21 }
 0x13d   : > { %v1328_v18 = vmax.f32 %v676_v19, %v1296_v23  ;;  %v714_v24 = vpop.f32.mrb[4].mxu0 }
 0x13e   : > { %v715_v26 = vadd.f32 %v714_v24, %v4594_v12  ;;  %v716_v27 = vpop.f32.mrb[5].mxu0 }
 0x13f   : > { %v717_v29 = vadd.f32 %v716_v27, %v4594_v12  ;;  %v718_v30 = vpop.f32.mrb[6].mxu0  ;;  %v755_v31 = vpop.f32.mrb[4].mxu1  ;;  %1369 = vmatprep.subr.mxu1 %v1328_v18 }
 0x140   : > { %v1297_v32 = vmul.f32 0.01, %v715_v26  ;;  %v756_v33 = vadd.f32 %v755_v31, %v4594_v12  ;;  %v719_v34 = vpop.f32.mrb[7].mxu0  ;;  %v757_v35 = vpop.f32.mrb[5].mxu1  ;;  %1370 = vmatpush1.msra.mxu1 %v1327_v25 }
 0x141   : > { %v1298_v36 = vmul.f32 0.01, %v717_v29  ;;  %v758_v37 = vadd.f32 %v757_v35, %v4594_v12  ;;  %3996 = vmatmul.mubr.msk.f32.vlgmr.msra.gmra.mrb[32].mxu1 %vm412_vm2, %v4602_v28  ;;  %v759_v38 = vpop.f32.mrb[6].mxu1 }
 0x142   : > { %v1299_v39 = vmul.f32 0.01, %v756_v33  ;;  %v760_v40 = vpop.f32.mrb[7].mxu1  ;;  %1504 = vmatprep.mubr.f32.mxu1 %v4263_v0  ;;  %v1329_v43 = vmax.f32 %v715_v26, %v1297_v32 }
 0x143   : > { %v1330_v41 = vmax.f32 %v717_v29, %v1298_v36  ;;  %v1300_v42 = vmul.f32 0.01, %v758_v37 }
 0x144   : > { %v1331_v46 = vmax.f32 %v756_v33, %v1299_v39 }
 0x145   : > { %v1332_v44 = vmax.f32 %v758_v37, %v1300_v42  ;;  %v796_v45 = vpop.f32.mrb[8].mxu0  ;;  %1440 = vmatprep.subr.mxu1 %v1330_v41 }
 0x146   : > { %v797_v47 = vadd.f32 %v796_v45, %v4594_v12  ;;  %v798_v48 = vpop.f32.mrb[9].mxu0  ;;  %1441 = vmatpush1.msra.mxu1 %v1329_v43 }
 0x147   : > { %v799_v49 = vadd.f32 %v798_v48, %v4594_v12  ;;  %v800_v50 = vpop.f32.mrb[10].mxu0  ;;  %v837_v51 = vpop.f32.mrb[8].mxu1  ;;  %3997 = vmatmul.mubr.msk.f32.vlgmr.msra.gmra.mrb[34].mxu1 %vm412_vm2, %v4602_v28  ;;  %1511 = vmatprep.subr.mxu0 %v1332_v44 }
 0x148   : > { %v1301_v52 = vmul.f32 0.01, %v797_v47  ;;  %v838_v53 = vadd.f32 %v837_v51, %v4594_v12  ;;  %v801_v54 = vpop.f32.mrb[11].mxu0  ;;  %v839_v55 = vpop.f32.mrb[9].mxu1  ;;  %1512 = vmatpush1.msra.mxu0 %v1331_v46  ;;  %1646 = vmatprep.mubr.f32.mxu1 %v4263_v0 }
 0x149   : > { %v1302_v56 = vmul.f32 0.01, %v799_v49  ;;  %v840_v57 = vadd.f32 %v839_v55, %v4594_v12  ;;  %3998 = vmatmul.mubr.msk.f32.vlgmr.msra.gmra.mrb[36].mxu0 %vm412_vm2, %v4602_v28  ;;  %v841_v58 = vpop.f32.mrb[10].mxu1 }
 0x14a   : > { %v1303_v59 = vmul.f32 0.01, %v838_v53  ;;  %v842_v60 = vpop.f32.mrb[11].mxu1  ;;  %1717 = vmatprep.mubr.f32.mxu0 %v4263_v0  ;;  %v1333_v63 = vmax.f32 %v797_v47, %v1301_v52 }
 0x14b   : > { %v1334_v61 = vmax.f32 %v799_v49, %v1302_v56  ;;  %v1304_v62 = vmul.f32 0.01, %v840_v57 }
 0x14c   : > { %v1335_v4 = vmax.f32 %v838_v53, %v1303_v59 }
 0x14d   : > { %v1336_v2 = vmax.f32 %v840_v57, %v1304_v62  ;;  %v878_v3 = vpop.f32.mrb[12].mxu0  ;;  %1582 = vmatprep.subr.mxu1 %v1334_v61 }
 0x14e   : > { %v879_v5 = vadd.f32 %v878_v3, %v4594_v12  ;;  %v880_v6 = vpop.f32.mrb[13].mxu0  ;;  %1583 = vmatpush1.msra.mxu1 %v1333_v63 }
 0x14f   : > { %v881_v7 = vadd.f32 %v880_v6, %v4594_v12  ;;  %v882_v8 = vpop.f32.mrb[14].mxu0  ;;  %v919_v9 = vpop.f32.mrb[12].mxu1  ;;  %3999 = vmatmul.mubr.msk.f32.vlgmr.msra.gmra.mrb[36].mxu1 %vm412_vm2, %v4602_v28  ;;  %1653 = vmatprep.subr.mxu0 %v1336_v2 }
 0x150   : > { %v1305_v10 = vmul.f32 0.01, %v879_v5  ;;  %v920_v11 = vadd.f32 %v919_v9, %v4594_v12  ;;  %v883_v13 = vpop.f32.mrb[15].mxu0  ;;  %v921_v14 = vpop.f32.mrb[13].mxu1  ;;  %1654 = vmatpush1.msra.mxu0 %v1335_v4  ;;  %1788 = vmatprep.mubr.f32.mxu1 %v4263_v0 }
 0x151   : > { %v1306_v15 = vmul.f32 0.01, %v881_v7  ;;  %v922_v16 = vadd.f32 %v921_v14, %v4594_v12  ;;  %4000 = vmatmul.mubr.msk.f32.vlgmr.msra.gmra.mrb[38].mxu0 %vm412_vm2, %v4602_v28  ;;  %v923_v1 = vpop.f32.mrb[14].mxu1 }
 0x152   : > { %v1307_v17 = vmul.f32 0.01, %v920_v11  ;;  %v924_v19 = vpop.f32.mrb[15].mxu1  ;;  %1859 = vmatprep.mubr.f32.mxu0 %v4263_v0  ;;  %v1337_v22 = vmax.f32 %v879_v5, %v1305_v10 }
 0x153   : > { %v1338_v20 = vmax.f32 %v881_v7, %v1306_v15  ;;  %v1308_v21 = vmul.f32 0.01, %v922_v16 }
 0x154   : > { %v1339_v24 = vmax.f32 %v920_v11, %v1307_v17 }
 0x155   : > { %v1340_v23 = vmax.f32 %v922_v16, %v1308_v21  ;;  %v960_v18 = vpop.f32.mrb[16].mxu0  ;;  %1724 = vmatprep.subr.mxu1 %v1338_v20 }
 0x156   : > { %v961_v25 = vadd.f32 %v960_v18, %v4594_v12  ;;  %v962_v26 = vpop.f32.mrb[17].mxu0  ;;  %1725 = vmatpush1.msra.mxu1 %v1337_v22 }
 0x157   : > { %v963_v27 = vadd.f32 %v962_v26, %v4594_v12  ;;  %v964_v29 = vpop.f32.mrb[18].mxu0  ;;  %v1001_v30 = vpop.f32.mrb[16].mxu1  ;;  %4001 = vmatmul.mubr.msk.f32.vlgmr.msra.gmra.mrb[38].mxu1 %vm412_vm2, %v4602_v28  ;;  %1795 = vmatprep.subr.mxu0 %v1340_v23 }
 0x158   : > { %v1309_v31 = vmul.f32 0.01, %v961_v25  ;;  %v1002_v32 = vadd.f32 %v1001_v30, %v4594_v12  ;;  %v965_v33 = vpop.f32.mrb[19].mxu0  ;;  %v1003_v34 = vpop.f32.mrb[17].mxu1  ;;  %1796 = vmatpush1.msra.mxu0 %v1339_v24  ;;  %1930 = vmatprep.mubr.f32.mxu1 %v4263_v0 }
 0x159   : > { %v1310_v35 = vmul.f32 0.01, %v963_v27  ;;  %v1004_v36 = vadd.f32 %v1003_v34, %v4594_v12  ;;  %4002 = vmatmul.mubr.msk.f32.vlgmr.msra.gmra.mrb[40].mxu0 %vm412_vm2, %v4602_v28  ;;  %v1005_v37 = vpop.f32.mrb[18].mxu1 }
 0x15a   : > { %v1311_v38 = vmul.f32 0.01, %v1002_v32  ;;  %v1006_v39 = vpop.f32.mrb[19].mxu1  ;;  %2001 = vmatprep.mubr.f32.mxu0 %v4263_v0  ;;  %v1341_v42 = vmax.f32 %v961_v25, %v1309_v31 }
 0x15b   : > { %v1342_v40 = vmax.f32 %v963_v27, %v1310_v35  ;;  %v1312_v41 = vmul.f32 0.01, %v1004_v36 }
 0x15c   : > { %v1343_v45 = vmax.f32 %v1002_v32, %v1311_v38 }
 0x15d   : > { %v1344_v43 = vmax.f32 %v1004_v36, %v1312_v41  ;;  %v1042_v44 = vpop.f32.mrb[20].mxu0  ;;  %1866 = vmatprep.subr.mxu1 %v1342_v40 }
 0x15e   : > { %v1043_v46 = vadd.f32 %v1042_v44, %v4594_v12  ;;  %v1044_v47 = vpop.f32.mrb[21].mxu0  ;;  %1867 = vmatpush1.msra.mxu1 %v1341_v42 }
 0x15f   : > { %v1045_v48 = vadd.f32 %v1044_v47, %v4594_v12  ;;  %v1046_v49 = vpop.f32.mrb[22].mxu0  ;;  %v1083_v50 = vpop.f32.mrb[20].mxu1  ;;  %4003 = vmatmul.mubr.msk.f32.vlgmr.msra.gmra.mrb[40].mxu1 %vm412_vm2, %v4602_v28  ;;  %1937 = vmatprep.subr.mxu0 %v1344_v43 }
 0x160   : > { %v1313_v51 = vmul.f32 0.01, %v1043_v46  ;;  %v1084_v52 = vadd.f32 %v1083_v50, %v4594_v12  ;;  %v1047_v53 = vpop.f32.mrb[23].mxu0  ;;  %v1085_v54 = vpop.f32.mrb[21].mxu1  ;;  %1938 = vmatpush1.msra.mxu0 %v1343_v45  ;;  %2072 = vmatprep.mubr.f32.mxu1 %v4263_v0 }
 0x161   : > { %v1314_v55 = vmul.f32 0.01, %v1045_v48  ;;  %v1086_v56 = vadd.f32 %v1085_v54, %v4594_v12  ;;  %4004 = vmatmul.mubr.msk.f32.vlgmr.msra.gmra.mrb[42].mxu0 %vm412_vm2, %v4602_v28  ;;  %v1087_v57 = vpop.f32.mrb[22].mxu1  ;;  %v4684_v54 = vpop.permute.xlu0 %1363 }
 0x162   : > { %v1315_v58 = vmul.f32 0.01, %v1084_v52  ;;  %v1088_v59 = vpop.f32.mrb[23].mxu1  ;;  %2143 = vmatprep.mubr.f32.mxu0 %v4263_v0  ;;  %v1345_v62 = vmax.f32 %v1043_v46, %v1313_v51 }
 0x163   : > { %v1346_v60 = vmax.f32 %v1045_v48, %v1314_v55  ;;  %v1316_v61 = vmul.f32 0.01, %v1086_v56 }
 0x164   : > { %v1347_v3 = vmax.f32 %v1084_v52, %v1315_v58 }
 0x165   : > { %v1348_v63 = vmax.f32 %v1086_v56, %v1316_v61  ;;  %v1124_v2 = vpop.f32.mrb[24].mxu0  ;;  %2008 = vmatprep.subr.mxu1 %v1346_v60 }
 0x166   : > { %v1125_v4 = vadd.f32 %v1124_v2, %v4594_v12  ;;  %v1126_v5 = vpop.f32.mrb[25].mxu0  ;;  %2009 = vmatpush1.msra.mxu1 %v1345_v62 }
 0x167   : > { %v1127_v6 = vadd.f32 %v1126_v5, %v4594_v12  ;;  %v1128_v7 = vpop.f32.mrb[26].mxu0  ;;  %v1165_v8 = vpop.f32.mrb[24].mxu1  ;;  %4005 = vmatmul.mubr.msk.f32.vlgmr.msra.gmra.mrb[42].mxu1 %vm412_vm2, %v4602_v28  ;;  %2079 = vmatprep.subr.mxu0 %v1348_v63 }
 0x168   : > { %v1317_v9 = vmul.f32 0.01, %v1125_v4  ;;  %v1166_v10 = vadd.f32 %v1165_v8, %v4594_v12  ;;  %v1129_v11 = vpop.f32.mrb[27].mxu0  ;;  %v1167_v13 = vpop.f32.mrb[25].mxu1  ;;  %2080 = vmatpush1.msra.mxu0 %v1347_v3  ;;  %2214 = vmatprep.mubr.f32.mxu1 %v4263_v0  ;;  %v4692_v3 = vld [vmem:[%s4865_s7] sm:$0xff] }
 0x169   : > { %v1318_v14 = vmul.f32 0.01, %v1127_v6  ;;  %v1168_v15 = vadd.f32 %v1167_v13, %v4594_v12  ;;  %4006 = vmatmul.mubr.msk.f32.vlgmr.msra.gmra.mrb[44].mxu0 %vm412_vm2, %v4602_v28  ;;  %v1169_v16 = vpop.f32.mrb[26].mxu1 }
 0x16a   : > { %v1319_v1 = vmul.f32 0.01, %v1166_v10  ;;  %v1170_v17 = vpop.f32.mrb[27].mxu1  ;;  %2285 = vmatprep.mubr.f32.mxu0 %v4263_v0  ;;  %v1349_v21 = vmax.f32 %v1125_v4, %v1317_v9 }
 0x16b   : > { %v1350_v19 = vmax.f32 %v1127_v6, %v1318_v14  ;;  %v1320_v20 = vmul.f32 0.01, %v1168_v15 }
 0x16c   : > { %v1351_v18 = vmax.f32 %v1166_v10, %v1319_v1 }
 0x16d   : > { %v1352_v22 = vmax.f32 %v1168_v15, %v1320_v20  ;;  %v1206_v23 = vpop.f32.mrb[28].mxu0  ;;  %2150 = vmatprep.subr.mxu1 %v1350_v19 }
 0x16e   : > { %v1207_v24 = vadd.f32 %v1206_v23, %v4594_v12  ;;  %v1208_v25 = vpop.f32.mrb[29].mxu0  ;;  %2151 = vmatpush1.msra.mxu1 %v1349_v21 }
 0x16f   : > { %v1209_v26 = vadd.f32 %v1208_v25, %v4594_v12  ;;  %v1210_v27 = vpop.f32.mrb[30].mxu0  ;;  %v1247_v29 = vpop.f32.mrb[28].mxu1  ;;  %4007 = vmatmul.mubr.msk.f32.vlgmr.msra.gmra.mrb[44].mxu1 %vm412_vm2, %v4602_v28  ;;  %2221 = vmatprep.subr.mxu0 %v1352_v22 }
 0x170   : > { %v1321_v30 = vmul.f32 0.01, %v1207_v24  ;;  %v1248_v31 = vadd.f32 %v1247_v29, %v4594_v12  ;;  %v1211_v32 = vpop.f32.mrb[31].mxu0  ;;  %v1249_v33 = vpop.f32.mrb[29].mxu1  ;;  %2222 = vmatpush1.msra.mxu0 %v1351_v18  ;;  %2356 = vmatprep.mubr.f32.mxu1 %v4263_v0 }
 0x171   : > { %v1322_v34 = vmul.f32 0.01, %v1209_v26  ;;  %v1250_v35 = vadd.f32 %v1249_v33, %v4594_v12  ;;  %4008 = vmatmul.mubr.msk.f32.vlgmr.msra.gmra.mrb[46].mxu0 %vm412_vm2, %v4602_v28  ;;  %v1251_v36 = vpop.f32.mrb[30].mxu1 }
 0x172   : > { %v1323_v37 = vmul.f32 0.01, %v1248_v31  ;;  %v1252_v38 = vpop.f32.mrb[31].mxu1  ;;  %2427 = vmatprep.mubr.f32.mxu0 %v4263_v0  ;;  %v1353_v41 = vmax.f32 %v1207_v24, %v1321_v30 }
 0x173   : > { %v1354_v39 = vmax.f32 %v1209_v26, %v1322_v34  ;;  %v1324_v40 = vmul.f32 0.01, %v1250_v35 }
 0x174   : > { %v1355_v44 = vmax.f32 %v1248_v31, %v1323_v37 }
 0x175   : > { %v1356_v42 = vmax.f32 %v1250_v35, %v1324_v40  ;;  %v1288_v43 = vpop.f32.mrb[32].mxu0  ;;  %2292 = vmatprep.subr.mxu1 %v1354_v39 }
 0x176   : > { %v1289_v45 = vadd.f32 %v1288_v43, %v4594_v12  ;;  %v1290_v46 = vpop.f32.mrb[33].mxu0  ;;  %2293 = vmatpush1.msra.mxu1 %v1353_v41 }
 0x177   : > { %v1291_v47 = vadd.f32 %v1290_v46, %v4594_v12  ;;  %v1292_v48 = vpop.f32.mrb[34].mxu0  ;;  %4009 = vmatmul.mubr.msk.f32.vlgmr.msra.gmra.mrb[46].mxu1 %vm412_vm2, %v4602_v28  ;;  %2363 = vmatprep.subr.mxu0 %v1356_v42  ;;  %v2570_v12 = vld [vmem:[%s4866_s8] sm:$0xff] }
 0x178   : > { %v1325_v49 = vmul.f32 0.01, %v1289_v45  ;;  %v1293_v50 = vpop.f32.mrb[35].mxu0  ;;  %2364 = vmatpush1.msra.mxu0 %v1355_v44  ;;  %2498 = vmatprep.mubr.f32.mxu1 %v4263_v0 }
 0x179   : > { %v1326_v51 = vmul.f32 0.01, %v1291_v47  ;;  %4010 = vmatmul.mubr.msk.f32.vlgmr.msra.gmra.mrb[48].mxu0 %vm412_vm2, %v4602_v28  ;;  %2573 = vperm.xlu1 %4096, %v2570_v12  }
 0x17a   : > { %2643 = vmatprep.mubr.f32.mxu0 %v4263_v0  ;;  %v1357_v53 = vmax.f32 %v1289_v45, %v1325_v49 }
 0x17b   : > { %v1358_v52 = vmax.f32 %v1291_v47, %v1326_v51 }
 0x17d   : > { %2434 = vmatprep.subr.mxu1 %v1358_v52 }
 0x17e   : > { %2435 = vmatpush1.msra.mxu1 %v1357_v53 }
 0x17f   : > { %4011 = vmatmul.mubr.msk.f32.vlgmr.msra.gmra.mrb[48].mxu1 %vm412_vm2, %v4602_v28 }
 0x180   : > { %2714 = vmatprep.mubr.f32.mxu1 %v4263_v0 }
 0x214   : > { %v1435_v55 = vpop.f32.mrb[32].mxu1 }
 0x215   : > { %v1436_v56 = vadd.f32 %v1435_v55, %v4684_v54  ;;  %v1437_v57 = vpop.f32.mrb[33].mxu1 }
 0x216   : > { %v1438_v58 = vadd.f32 %v1437_v57, %v4684_v54 }
 0x217   : > { %v2505_v59 = vmul.f32 0.01, %v1436_v56 }
 0x218   : > { %v2506_v60 = vmul.f32 0.01, %v1438_v58 }
 0x219   : > { %v2537_v28 = vmax.f32 %v1436_v56, %v2505_v59 }
 0x21a   : > { %v2538_v61 = vmax.f32 %v1438_v58, %v2506_v60  ;;  %v1506_v62 = vpop.f32.mrb[34].mxu1 }
 0x21b   : > { %v1507_v63 = vadd.f32 %v1506_v62, %v4684_v54  ;;  %v1508_v2 = vpop.f32.mrb[35].mxu1 }
 0x21c   : > { %v1509_v4 = vadd.f32 %v1508_v2, %v4684_v54  ;;  %v1577_v5 = vpop.f32.mrb[36].mxu0  ;;  %2579 = vmatprep.subr.mxu0 %v2538_v61 }
 0x21d   : > { %v2507_v6 = vmul.f32 0.01, %v1507_v63  ;;  %v1578_v7 = vadd.f32 %v1577_v5, %v4684_v54  ;;  %v1579_v8 = vpop.f32.mrb[37].mxu0  ;;  %2580 = vmatpush1.msra.mxu0 %v2537_v28 }
 0x21e   : > { %v2508_v9 = vmul.f32 0.01, %v1509_v4  ;;  %v1580_v10 = vadd.f32 %v1579_v8, %v4684_v54  ;;  %4012 = vmatmul.mubr.msk.f32.vlgmr.msra.gmra.mrb[50].mxu0 %vm412_vm2, %v4692_v3 }
 0x21f   : > { %v2509_v11 = vmul.f32 0.01, %v1578_v7  ;;  %2785 = vmatprep.mubr.f32.mxu0 %v4263_v0  ;;  %v2539_v15 = vmax.f32 %v1507_v63, %v2507_v6 }
 0x220   : > { %v2540_v13 = vmax.f32 %v1509_v4, %v2508_v9  ;;  %v2510_v14 = vmul.f32 0.01, %v1580_v10 }
 0x221   : > { %v2541_v17 = vmax.f32 %v1578_v7, %v2509_v11 }
 0x222   : > { %v2542_v16 = vmax.f32 %v1580_v10, %v2510_v14  ;;  %v1648_v1 = vpop.f32.mrb[36].mxu1  ;;  %2650 = vmatprep.subr.mxu1 %v2540_v13 }
 0x223   : > { %v1649_v19 = vadd.f32 %v1648_v1, %v4684_v54  ;;  %v1650_v20 = vpop.f32.mrb[37].mxu1  ;;  %2651 = vmatpush1.msra.mxu1 %v2539_v15 }
 0x224   : > { %v1651_v21 = vadd.f32 %v1650_v20, %v4684_v54  ;;  %v1719_v22 = vpop.f32.mrb[38].mxu0  ;;  %2721 = vmatprep.subr.mxu0 %v2542_v16  ;;  %4013 = vmatmul.mubr.msk.f32.vlgmr.msra.gmra.mrb[50].mxu1 %vm412_vm2, %v4692_v3 }
 0x225   : > { %v2511_v23 = vmul.f32 0.01, %v1649_v19  ;;  %v1720_v18 = vadd.f32 %v1719_v22, %v4684_v54  ;;  %v1721_v24 = vpop.f32.mrb[39].mxu0  ;;  %2722 = vmatpush1.msra.mxu0 %v2541_v17  ;;  %2856 = vmatprep.mubr.f32.mxu1 %v4263_v0 }
 0x226   : > { %v2512_v25 = vmul.f32 0.01, %v1651_v21  ;;  %v1722_v26 = vadd.f32 %v1721_v24, %v4684_v54  ;;  %4014 = vmatmul.mubr.msk.f32.vlgmr.msra.gmra.mrb[52].mxu0 %vm412_vm2, %v4692_v3 }
 0x227   : > { %v2513_v27 = vmul.f32 0.01, %v1720_v18  ;;  %2927 = vmatprep.mubr.f32.mxu0 %v4263_v0  ;;  %v2543_v31 = vmax.f32 %v1649_v19, %v2511_v23 }
 0x228   : > { %v2544_v29 = vmax.f32 %v1651_v21, %v2512_v25  ;;  %v2514_v30 = vmul.f32 0.01, %v1722_v26 }
 0x229   : > { %v2545_v34 = vmax.f32 %v1720_v18, %v2513_v27 }
 0x22a   : > { %v2546_v32 = vmax.f32 %v1722_v26, %v2514_v30  ;;  %v1790_v33 = vpop.f32.mrb[38].mxu1  ;;  %2792 = vmatprep.subr.mxu1 %v2544_v29 }
 0x22b   : > { %v1791_v35 = vadd.f32 %v1790_v33, %v4684_v54  ;;  %v1792_v36 = vpop.f32.mrb[39].mxu1  ;;  %2793 = vmatpush1.msra.mxu1 %v2543_v31 }
 0x22c   : > { %v1793_v37 = vadd.f32 %v1792_v36, %v4684_v54  ;;  %v1861_v38 = vpop.f32.mrb[40].mxu0  ;;  %2863 = vmatprep.subr.mxu0 %v2546_v32  ;;  %4015 = vmatmul.mubr.msk.f32.vlgmr.msra.gmra.mrb[52].mxu1 %vm412_vm2, %v4692_v3 }
 0x22d   : > { %v2515_v39 = vmul.f32 0.01, %v1791_v35  ;;  %v1862_v40 = vadd.f32 %v1861_v38, %v4684_v54  ;;  %v1863_v41 = vpop.f32.mrb[41].mxu0  ;;  %2864 = vmatpush1.msra.mxu0 %v2545_v34  ;;  %2998 = vmatprep.mubr.f32.mxu1 %v4263_v0 }
 0x22e   : > { %v2516_v42 = vmul.f32 0.01, %v1793_v37  ;;  %v1864_v43 = vadd.f32 %v1863_v41, %v4684_v54  ;;  %4016 = vmatmul.mubr.msk.f32.vlgmr.msra.gmra.mrb[54].mxu0 %vm412_vm2, %v4692_v3 }
 0x22f   : > { %v2517_v44 = vmul.f32 0.01, %v1862_v40  ;;  %3069 = vmatprep.mubr.f32.mxu0 %v4263_v0  ;;  %v2547_v47 = vmax.f32 %v1791_v35, %v2515_v39 }
 0x230   : > { %v2548_v45 = vmax.f32 %v1793_v37, %v2516_v42  ;;  %v2518_v46 = vmul.f32 0.01, %v1864_v43 }
 0x231   : > { %v2549_v50 = vmax.f32 %v1862_v40, %v2517_v44 }
 0x232   : > { %v2550_v48 = vmax.f32 %v1864_v43, %v2518_v46  ;;  %v1932_v49 = vpop.f32.mrb[40].mxu1  ;;  %2934 = vmatprep.subr.mxu1 %v2548_v45 }
 0x233   : > { %v1933_v51 = vadd.f32 %v1932_v49, %v4684_v54  ;;  %v1934_v52 = vpop.f32.mrb[41].mxu1  ;;  %2935 = vmatpush1.msra.mxu1 %v2547_v47 }
 0x234   : > { %v1935_v53 = vadd.f32 %v1934_v52, %v4684_v54  ;;  %v2003_v12 = vpop.f32.mrb[42].mxu0  ;;  %3005 = vmatprep.subr.mxu0 %v2550_v48  ;;  %4017 = vmatmul.mubr.msk.f32.vlgmr.msra.gmra.mrb[54].mxu1 %vm412_vm2, %v4692_v3 }
 0x235   : > { %v2519_v55 = vmul.f32 0.01, %v1933_v51  ;;  %v2004_v56 = vadd.f32 %v2003_v12, %v4684_v54  ;;  %v2005_v57 = vpop.f32.mrb[43].mxu0  ;;  %3006 = vmatpush1.msra.mxu0 %v2549_v50  ;;  %3140 = vmatprep.mubr.f32.mxu1 %v4263_v0 }
 0x236   : > { %v2520_v58 = vmul.f32 0.01, %v1935_v53  ;;  %v2006_v59 = vadd.f32 %v2005_v57, %v4684_v54  ;;  %4018 = vmatmul.mubr.msk.f32.vlgmr.msra.gmra.mrb[56].mxu0 %vm412_vm2, %v4692_v3 }
 0x237   : > { %v2521_v60 = vmul.f32 0.01, %v2004_v56  ;;  %3211 = vmatprep.mubr.f32.mxu0 %v4263_v0  ;;  %v2551_v28 = vmax.f32 %v1933_v51, %v2519_v55 }
 0x238   : > { %v2552_v61 = vmax.f32 %v1935_v53, %v2520_v58  ;;  %v2522_v62 = vmul.f32 0.01, %v2006_v59 }
 0x239   : > { %v2553_v4 = vmax.f32 %v2004_v56, %v2521_v60 }
 0x23a   : > { %v2554_v63 = vmax.f32 %v2006_v59, %v2522_v62  ;;  %v2074_v2 = vpop.f32.mrb[42].mxu1  ;;  %3076 = vmatprep.subr.mxu1 %v2552_v61 }
 0x23b   : > { %v2075_v5 = vadd.f32 %v2074_v2, %v4684_v54  ;;  %v2076_v6 = vpop.f32.mrb[43].mxu1  ;;  %3077 = vmatpush1.msra.mxu1 %v2551_v28 }
 0x23c   : > { %v2077_v7 = vadd.f32 %v2076_v6, %v4684_v54  ;;  %v2145_v8 = vpop.f32.mrb[44].mxu0  ;;  %3147 = vmatprep.subr.mxu0 %v2554_v63  ;;  %4019 = vmatmul.mubr.msk.f32.vlgmr.msra.gmra.mrb[56].mxu1 %vm412_vm2, %v4692_v3 }
 0x23d   : > { %v2523_v9 = vmul.f32 0.01, %v2075_v5  ;;  %v2146_v10 = vadd.f32 %v2145_v8, %v4684_v54  ;;  %v2147_v11 = vpop.f32.mrb[45].mxu0  ;;  %3148 = vmatpush1.msra.mxu0 %v2553_v4  ;;  %3282 = vmatprep.mubr.f32.mxu1 %v4263_v0 }
 0x23e   : > { %v2524_v13 = vmul.f32 0.01, %v2077_v7  ;;  %v2148_v14 = vadd.f32 %v2147_v11, %v4684_v54  ;;  %4020 = vmatmul.mubr.msk.f32.vlgmr.msra.gmra.mrb[58].mxu0 %vm412_vm2, %v4692_v3 }
 0x23f   : > { %v2525_v15 = vmul.f32 0.01, %v2146_v10  ;;  %3353 = vmatprep.mubr.f32.mxu0 %v4263_v0  ;;  %v2555_v17 = vmax.f32 %v2075_v5, %v2523_v9 }
 0x240   : > { %v2556_v16 = vmax.f32 %v2077_v7, %v2524_v13  ;;  %v2526_v1 = vmul.f32 0.01, %v2148_v14 }
 0x241   : > { %v2557_v21 = vmax.f32 %v2146_v10, %v2525_v15 }
 0x242   : > { %v2558_v19 = vmax.f32 %v2148_v14, %v2526_v1  ;;  %v2216_v20 = vpop.f32.mrb[44].mxu1  ;;  %3218 = vmatprep.subr.mxu1 %v2556_v16 }
 0x243   : > { %v2217_v22 = vadd.f32 %v2216_v20, %v4684_v54  ;;  %v2218_v23 = vpop.f32.mrb[45].mxu1  ;;  %3219 = vmatpush1.msra.mxu1 %v2555_v17 }
 0x244   : > { %v2219_v18 = vadd.f32 %v2218_v23, %v4684_v54  ;;  %v2287_v24 = vpop.f32.mrb[46].mxu0  ;;  %3289 = vmatprep.subr.mxu0 %v2558_v19  ;;  %4021 = vmatmul.mubr.msk.f32.vlgmr.msra.gmra.mrb[58].mxu1 %vm412_vm2, %v4692_v3 }
 0x245   : > { %v2527_v25 = vmul.f32 0.01, %v2217_v22  ;;  %v2288_v26 = vadd.f32 %v2287_v24, %v4684_v54  ;;  %v2289_v27 = vpop.f32.mrb[47].mxu0  ;;  %3290 = vmatpush1.msra.mxu0 %v2557_v21  ;;  %3424 = vmatprep.mubr.f32.mxu1 %v4263_v0 }
 0x246   : > { %v2528_v29 = vmul.f32 0.01, %v2219_v18  ;;  %v2290_v30 = vadd.f32 %v2289_v27, %v4684_v54  ;;  %4022 = vmatmul.mubr.msk.f32.vlgmr.msra.gmra.mrb[60].mxu0 %vm412_vm2, %v4692_v3 }
 0x247   : > { %v2529_v31 = vmul.f32 0.01, %v2288_v26  ;;  %3495 = vmatprep.mubr.f32.mxu0 %v4263_v0  ;;  %v2559_v34 = vmax.f32 %v2217_v22, %v2527_v25 }
 0x248   : > { %v2560_v32 = vmax.f32 %v2219_v18, %v2528_v29  ;;  %v2530_v33 = vmul.f32 0.01, %v2290_v30 }
 0x249   : > { %v2561_v37 = vmax.f32 %v2288_v26, %v2529_v31 }
 0x24a   : > { %v2562_v35 = vmax.f32 %v2290_v30, %v2530_v33  ;;  %v2358_v36 = vpop.f32.mrb[46].mxu1  ;;  %3360 = vmatprep.subr.mxu1 %v2560_v32 }
 0x24b   : > { %v2359_v38 = vadd.f32 %v2358_v36, %v4684_v54  ;;  %v2360_v39 = vpop.f32.mrb[47].mxu1  ;;  %3361 = vmatpush1.msra.mxu1 %v2559_v34 }
 0x24c   : > { %v2361_v40 = vadd.f32 %v2360_v39, %v4684_v54  ;;  %v2429_v41 = vpop.f32.mrb[48].mxu0  ;;  %3431 = vmatprep.subr.mxu0 %v2562_v35  ;;  %4023 = vmatmul.mubr.msk.f32.vlgmr.msra.gmra.mrb[60].mxu1 %vm412_vm2, %v4692_v3 }
 0x24d   : > { %v2531_v42 = vmul.f32 0.01, %v2359_v38  ;;  %v2430_v43 = vadd.f32 %v2429_v41, %v4684_v54  ;;  %v2431_v44 = vpop.f32.mrb[49].mxu0  ;;  %3432 = vmatpush1.msra.mxu0 %v2561_v37  ;;  %3566 = vmatprep.mubr.f32.mxu1 %v4263_v0 }
 0x24e   : > { %v2532_v45 = vmul.f32 0.01, %v2361_v40  ;;  %v2432_v46 = vadd.f32 %v2431_v44, %v4684_v54  ;;  %4024 = vmatmul.mubr.msk.f32.vlgmr.msra.gmra.mrb[62].mxu0 %vm412_vm2, %v4692_v3 }
 0x24f   : > { %v2533_v47 = vmul.f32 0.01, %v2430_v43  ;;  %3637 = vmatprep.mubr.f32.mxu0 %v4263_v0  ;;  %v2563_v50 = vmax.f32 %v2359_v38, %v2531_v42 }
 0x250   : > { %v2564_v48 = vmax.f32 %v2361_v40, %v2532_v45  ;;  %v2534_v49 = vmul.f32 0.01, %v2432_v46 }
 0x251   : > { %v2565_v53 = vmax.f32 %v2430_v43, %v2533_v47 }
 0x252   : > { %v2566_v51 = vmax.f32 %v2432_v46, %v2534_v49  ;;  %v2500_v52 = vpop.f32.mrb[48].mxu1  ;;  %3502 = vmatprep.subr.mxu1 %v2564_v48 }
 0x253   : > { %v2501_v12 = vadd.f32 %v2500_v52, %v4684_v54  ;;  %v2502_v55 = vpop.f32.mrb[49].mxu1  ;;  %3503 = vmatpush1.msra.mxu1 %v2563_v50 }
 0x254   : > { %v2503_v56 = vadd.f32 %v2502_v55, %v4684_v54  ;;  %3573 = vmatprep.subr.mxu0 %v2566_v51  ;;  %4025 = vmatmul.mubr.msk.f32.vlgmr.msra.gmra.mrb[62].mxu1 %vm412_vm2, %v4692_v3  ;;  %v4769_v54 = vpop.permute.xlu1 %2573 }
 0x255   : > { %v2535_v57 = vmul.f32 0.01, %v2501_v12  ;;  %3574 = vmatpush1.msra.mxu0 %v2565_v53  ;;  %3708 = vmatprep.mubr.f32.mxu1 %v4263_v0 }
 0x256   : > { %v2536_v58 = vmul.f32 0.01, %v2503_v56  ;;  %4026 = vmatmul.mubr.msk.f32.vlgmr.msra.gmra.mrb[64].mxu0 %vm412_vm2, %v4692_v3 }
 0x257   : > { %v2567_v60 = vmax.f32 %v2501_v12, %v2535_v57 }
 0x258   : > { %v2568_v59 = vmax.f32 %v2503_v56, %v2536_v58 }
 0x25a   : > { %3644 = vmatprep.subr.mxu1 %v2568_v59 }
 0x25b   : > { %3645 = vmatpush1.msra.mxu1 %v2567_v60 }
 0x25c   : > { %4027 = vmatmul.mubr.msk.f32.vlgmr.msra.gmra.mrb[64].mxu1 %vm412_vm2, %v4692_v3 }
 0x2f1   : > { %v2645_v61 = vpop.f32.mrb[50].mxu0 }
 0x2f2   : > { %v2647_v62 = vpop.f32.mrb[51].mxu0  ;;  %v2646_v28 = vadd.f32 %v2645_v61, %v4769_v54 }
 0x2f3   : > { %v2648_v63 = vadd.f32 %v2647_v62, %v4769_v54 }
 0x2f4   : > { %v3715_v0 = vmul.f32 0.01, %v2646_v28 }
 0x2f5   : > { %v3716_v2 = vmul.f32 0.01, %v2648_v63 }
 0x2f6   : > { %v3747_v4 = vmax.f32 %v2646_v28, %v3715_v0 }
 0x2f7   : > { %v2716_v5 = vpop.f32.mrb[50].mxu1  ;;  %v3748_v6 = vmax.f32 %v2648_v63, %v3716_v2 }
 0x2f8   : > { %v2718_v7 = vpop.f32.mrb[51].mxu1  ;;  %v2717_v8 = vadd.f32 %v2716_v5, %v4769_v54 }
 0x2f9   : > { %v2787_v9 = vpop.f32.mrb[52].mxu0  ;;  %v2719_v10 = vadd.f32 %v2718_v7, %v4769_v54  ;;  %v3779_v3 = vmax.f32 %v3747_v4, %v3748_v6 }
 0x2fa   : > { %v2789_v11 = vpop.f32.mrb[53].mxu0  ;;  %v2788_v13 = vadd.f32 %v2787_v9, %v4769_v54  ;;  %v3717_v14 = vmul.f32 0.01, %v2717_v8 }
 0x2fb   : > { %v2790_v15 = vadd.f32 %v2789_v11, %v4769_v54  ;;  %v3718_v16 = vmul.f32 0.01, %v2719_v10 }
 0x2fc   : > { %v3719_v1 = vmul.f32 0.01, %v2788_v13  ;;  %v3749_v17 = vmax.f32 %v2717_v8, %v3717_v14 }
 0x2fd   : > { %v3720_v19 = vmul.f32 0.01, %v2790_v15  ;;  %v3750_v20 = vmax.f32 %v2719_v10, %v3718_v16 }
 0x2fe   : > { %v3751_v21 = vmax.f32 %v2788_v13, %v3719_v1 }
 0x2ff   : > { %v2858_v22 = vpop.f32.mrb[52].mxu1  ;;  %v3752_v23 = vmax.f32 %v2790_v15, %v3720_v19  ;;  %v3780_v18 = vmax.f32 %v3749_v17, %v3750_v20 }
 0x300   : > { %v2860_v24 = vpop.f32.mrb[53].mxu1  ;;  %v2859_v25 = vadd.f32 %v2858_v22, %v4769_v54 }
 0x301   : > { %v2929_v26 = vpop.f32.mrb[54].mxu0  ;;  %v2861_v27 = vadd.f32 %v2860_v24, %v4769_v54  ;;  %v3781_v29 = vmax.f32 %v3751_v21, %v3752_v23  ;;  %v3795_v30 = vmax.f32 %v3779_v3, %v3780_v18 }
 0x302   : > { %v2931_v31 = vpop.f32.mrb[55].mxu0  ;;  %v2930_v32 = vadd.f32 %v2929_v26, %v4769_v54  ;;  %v3721_v33 = vmul.f32 0.01, %v2859_v25 }
 0x303   : > { %v2932_v34 = vadd.f32 %v2931_v31, %v4769_v54  ;;  %v3722_v35 = vmul.f32 0.01, %v2861_v27 }
 0x304   : > { %v3723_v36 = vmul.f32 0.01, %v2930_v32  ;;  %v3753_v37 = vmax.f32 %v2859_v25, %v3721_v33 }
 0x305   : > { %v3724_v38 = vmul.f32 0.01, %v2932_v34  ;;  %v3754_v39 = vmax.f32 %v2861_v27, %v3722_v35 }
 0x306   : > { %v3755_v40 = vmax.f32 %v2930_v32, %v3723_v36 }
 0x307   : > { %v3000_v41 = vpop.f32.mrb[54].mxu1  ;;  %v3756_v42 = vmax.f32 %v2932_v34, %v3724_v38  ;;  %v3782_v43 = vmax.f32 %v3753_v37, %v3754_v39 }
 0x308   : > { %v3002_v44 = vpop.f32.mrb[55].mxu1  ;;  %v3001_v45 = vadd.f32 %v3000_v41, %v4769_v54 }
 0x309   : > { %v3071_v46 = vpop.f32.mrb[56].mxu0  ;;  %v3003_v47 = vadd.f32 %v3002_v44, %v4769_v54  ;;  %v3783_v48 = vmax.f32 %v3755_v40, %v3756_v42  ;;  %v3796_v49 = vmax.f32 %v3781_v29, %v3782_v43 }
 0x30a   : > { %v3072_v50 = vadd.f32 %v3071_v46, %v4769_v54  ;;  %v3073_v51 = vpop.f32.mrb[57].mxu0  ;;  %v3725_v52 = vmul.f32 0.01, %v3001_v45 }
 0x30b   : > { %v3074_v53 = vadd.f32 %v3073_v51, %v4769_v54  ;;  %v3726_v12 = vmul.f32 0.01, %v3003_v47  ;;  %v4785_v55 = vmax.f32 %v3795_v30, %v3796_v49 }
 0x30c   : > { %v3727_v56 = vmul.f32 0.01, %v3072_v50  ;;  %v3757_v57 = vmax.f32 %v3001_v45, %v3725_v52 }
 0x30d   : > { %v3728_v58 = vmul.f32 0.01, %v3074_v53  ;;  %v3758_v59 = vmax.f32 %v3003_v47, %v3726_v12 }
 0x30e   : > { %v3759_v60 = vmax.f32 %v3072_v50, %v3727_v56 }
 0x30f   : > { %v3142_v61 = vpop.f32.mrb[56].mxu1  ;;  %v3760_v62 = vmax.f32 %v3074_v53, %v3728_v58  ;;  %v3784_v28 = vmax.f32 %v3757_v57, %v3758_v59 }
 0x310   : > { %v3143_v63 = vadd.f32 %v3142_v61, %v4769_v54  ;;  %v3144_v0 = vpop.f32.mrb[57].mxu1 }
 0x311   : > { %v3785_v2 = vmax.f32 %v3759_v60, %v3760_v62  ;;  %v3145_v4 = vadd.f32 %v3144_v0, %v4769_v54  ;;  %v3797_v5 = vmax.f32 %v3783_v48, %v3784_v28  ;;  %v3213_v6 = vpop.f32.mrb[58].mxu0 }
 0x312   : > { %v3729_v7 = vmul.f32 0.01, %v3143_v63  ;;  %v3214_v8 = vadd.f32 %v3213_v6, %v4769_v54  ;;  %v3215_v9 = vpop.f32.mrb[59].mxu0 }
 0x313   : > { %v3730_v10 = vmul.f32 0.01, %v3145_v4  ;;  %v3216_v3 = vadd.f32 %v3215_v9, %v4769_v54 }
 0x314   : > { %v3761_v11 = vmax.f32 %v3143_v63, %v3729_v7  ;;  %v3731_v13 = vmul.f32 0.01, %v3214_v8 }
 0x315   : > { %v3762_v14 = vmax.f32 %v3145_v4, %v3730_v10  ;;  %v3732_v15 = vmul.f32 0.01, %v3216_v3 }
 0x316   : > { %v3763_v16 = vmax.f32 %v3214_v8, %v3731_v13 }
 0x317   : > { %v3786_v1 = vmax.f32 %v3761_v11, %v3762_v14  ;;  %v3284_v17 = vpop.f32.mrb[58].mxu1  ;;  %v3764_v19 = vmax.f32 %v3216_v3, %v3732_v15 }
 0x318   : > { %v3285_v20 = vadd.f32 %v3284_v17, %v4769_v54  ;;  %v3286_v21 = vpop.f32.mrb[59].mxu1 }
 0x319   : > { %v3798_v22 = vmax.f32 %v3785_v2, %v3786_v1  ;;  %v3787_v23 = vmax.f32 %v3763_v16, %v3764_v19  ;;  %v3287_v18 = vadd.f32 %v3286_v21, %v4769_v54  ;;  %v3355_v24 = vpop.f32.mrb[60].mxu0 }
 0x31a   : > { %v3733_v25 = vmul.f32 0.01, %v3285_v20  ;;  %v3356_v26 = vadd.f32 %v3355_v24, %v4769_v54  ;;  %v3357_v27 = vpop.f32.mrb[61].mxu0 }
 0x31b   : > { %v4794_v29 = vmax.f32 %v3797_v5, %v3798_v22  ;;  %v3734_v30 = vmul.f32 0.01, %v3287_v18  ;;  %v3358_v31 = vadd.f32 %v3357_v27, %v4769_v54 }
 0x31c   : > { %v3765_v32 = vmax.f32 %v3285_v20, %v3733_v25  ;;  %v3735_v33 = vmul.f32 0.01, %v3356_v26 }
 0x31d   : > { %v3807_v34 = vmax.f32 %v4785_v55, %v4794_v29  ;;  %v3766_v35 = vmax.f32 %v3287_v18, %v3734_v30  ;;  %v3736_v36 = vmul.f32 0.01, %v3358_v31 }
 0x31e   : > { %v3767_v37 = vmax.f32 %v3356_v26, %v3735_v33 }
 0x31f   : > { %v3788_v38 = vmax.f32 %v3765_v32, %v3766_v35  ;;  %v3426_v39 = vpop.f32.mrb[60].mxu1  ;;  %v3768_v40 = vmax.f32 %v3358_v31, %v3736_v36 }
 0x320   : > { %v3427_v41 = vadd.f32 %v3426_v39, %v4769_v54  ;;  %v3428_v42 = vpop.f32.mrb[61].mxu1 }
 0x321   : > { %v3799_v43 = vmax.f32 %v3787_v23, %v3788_v38  ;;  %v3789_v44 = vmax.f32 %v3767_v37, %v3768_v40  ;;  %v3429_v45 = vadd.f32 %v3428_v42, %v4769_v54  ;;  %v3497_v46 = vpop.f32.mrb[62].mxu0 }
 0x322   : > { %v3737_v47 = vmul.f32 0.01, %v3427_v41  ;;  %v3498_v48 = vadd.f32 %v3497_v46, %v4769_v54  ;;  %v3499_v49 = vpop.f32.mrb[63].mxu0 }
 0x323   : > { %v3738_v50 = vmul.f32 0.01, %v3429_v45  ;;  %v3500_v51 = vadd.f32 %v3499_v49, %v4769_v54 }
 0x324   : > { %v3769_v52 = vmax.f32 %v3427_v41, %v3737_v47  ;;  %v3739_v53 = vmul.f32 0.01, %v3498_v48 }
 0x325   : > { %v3770_v12 = vmax.f32 %v3429_v45, %v3738_v50  ;;  %v3740_v55 = vmul.f32 0.01, %v3500_v51 }
 0x326   : > { %v3771_v56 = vmax.f32 %v3498_v48, %v3739_v53 }
 0x327   : > { %v3790_v57 = vmax.f32 %v3769_v52, %v3770_v12  ;;  %v3568_v58 = vpop.f32.mrb[62].mxu1  ;;  %v3772_v59 = vmax.f32 %v3500_v51, %v3740_v55 }
 0x328   : > { %v3569_v60 = vadd.f32 %v3568_v58, %v4769_v54  ;;  %v3570_v61 = vpop.f32.mrb[63].mxu1 }
 0x329   : > { %v3800_v62 = vmax.f32 %v3789_v44, %v3790_v57  ;;  %v3791_v28 = vmax.f32 %v3771_v56, %v3772_v59  ;;  %v3571_v63 = vadd.f32 %v3570_v61, %v4769_v54  ;;  %v3639_v0 = vpop.f32.mrb[64].mxu0 }
 0x32a   : > { %v3741_v2 = vmul.f32 0.01, %v3569_v60  ;;  %v3640_v4 = vadd.f32 %v3639_v0, %v4769_v54  ;;  %v3641_v5 = vpop.f32.mrb[65].mxu0 }
 0x32b   : > { %v3805_v6 = vmax.f32 %v3799_v43, %v3800_v62  ;;  %v3742_v7 = vmul.f32 0.01, %v3571_v63  ;;  %v3642_v8 = vadd.f32 %v3641_v5, %v4769_v54 }
 0x32c   : > { %v3773_v9 = vmax.f32 %v3569_v60, %v3741_v2  ;;  %v3743_v10 = vmul.f32 0.01, %v3640_v4 }
 0x32d   : > { %v3774_v3 = vmax.f32 %v3571_v63, %v3742_v7  ;;  %v3744_v11 = vmul.f32 0.01, %v3642_v8 }
 0x32e   : > { %v3775_v13 = vmax.f32 %v3640_v4, %v3743_v10 }
 0x32f   : > { %v3792_v14 = vmax.f32 %v3773_v9, %v3774_v3  ;;  %v3710_v15 = vpop.f32.mrb[64].mxu1  ;;  %v3776_v16 = vmax.f32 %v3642_v8, %v3744_v11 }
 0x330   : > { %v3711_v1 = vadd.f32 %v3710_v15, %v4769_v54  ;;  %v3712_v17 = vpop.f32.mrb[65].mxu1 }
 0x331   : > { %v3801_v19 = vmax.f32 %v3791_v28, %v3792_v14  ;;  %v3793_v20 = vmax.f32 %v3775_v13, %v3776_v16  ;;  %v3713_v21 = vadd.f32 %v3712_v17, %v4769_v54 }
 0x332   : > { %v3745_v22 = vmul.f32 0.01, %v3711_v1 }
 0x333   : > { %v3746_v23 = vmul.f32 0.01, %v3713_v21 }
 0x334   : > { %v3777_v18 = vmax.f32 %v3711_v1, %v3745_v22 }
 0x335   : > { %v3778_v24 = vmax.f32 %v3713_v21, %v3746_v23 }
 0x337   : > { %v3794_v25 = vmax.f32 %v3777_v18, %v3778_v24 }
 0x339   : > { %v3802_v26 = vmax.f32 %v3793_v20, %v3794_v25 }
 0x33b   : > { %v3806_v27 = vmax.f32 %v3801_v19, %v3802_v26 }
 0x33d   : > { %v3808_v29 = vmax.f32 %v3805_v6, %v3806_v27 }
 0x33f   : > { %v3809_v30 = vmax.f32 %v3807_v34, %v3808_v29 }
 0x341   : > { %v3810_v31 = vpack.c.bf16 %v3809_v30, %v3809_v30 }
 0x343   : > { %3811 = vst [vmem:[%s385_s28] sm:$0xf] %v3810_v31 }
 0x344   : > { %4202 = shalt.err (!%p4199_p0)
}
 0x345   : > { %s4203_s14 = scalar_lea.hbm %s4815_s11, 64  ;;  %s4207_s24 = scalar_lea.hbm %s4867_s9, 512 }
 0x346   : > { %p4204_p10 = scmp.ne.s32.totalorder %s4815_s11, %s4203_s14  ;;  %p4208_p3 = scmp.lt.u32.totalorder %s4815_s11, %s4867_s9 }
 0x347   : > { %p4209_p9 = scmp.lt.u32.totalorder %s4207_s24, %s4203_s14  ;;  %p4211_p12 = scmp.lt.u32.totalorder %s4203_s14, %s4815_s11 }
 0x348   : > { %p4205_p11 = pnand %p4204_p10, %p4885_p2 }
 0x349   : > { %p4210_p6 = por %p4209_p9, %p4208_p3 }
 0x34a   : > { %p4206_p1 = pneg %p4205_p11 }
 0x34b   : > { %p4212_p4 = por %p4211_p12, %p4210_p6 }
 0x34d   : > { %p4213_p5 = pnand %p4212_p4, %p4206_p1 }
 0x34f   : > { %4216 = shalt.err (!%p4213_p5)
}
 0x350   : > { %4045 = dma.vmem_to_hbm [thread:$0]  (%p4885_p2), %s4817_s19, 64, %s4815_s11, %s3813_s27  }
 0x351 PF: > { %p4059_p7 = scmp.ge.s32.totalorder %s4259_s12, 2  ;;  %s3838_s28 = sand.u32 1, %s4247_s30  }
 0x352   : > { %p4886_p8 = scmp.ne.s32.totalorder %s4877_s22, 0  ;;  %s3839_s23 = scalar_lea.sflag [#allocation4], %s3838_s28 }
 0x354   : > { %p4055_p13 = pnand %p4059_p7, %p4886_p8 }
 0x356   : > { %4242 = dma.done.wait (!%p4055_p13), %s3839_s23, 64  }
 0x357   : > { %4244 = vsyncadd (!%p4055_p13), %s3839_s23, 4294967232  ;;  %s4887_s18 = sld [smem:[#allocation11_spill]]  ;;  %s4888_s11 = sld [smem:[#allocation12_spill]] }
 0x358   : > { %p25_p0 = scmp.ge.s32.totalorder %s4342_s15, 10   ;;  %s4889_s30 = smov %s4251_s10 }
 0x359   : > { %s4891_s12 = smov %s4342_s15 }
 0x35a   :  { %27 = sbr.rel (!%p25_p0) target bundleno = 9 (0x9), region = 114 }
 0x35d   : > { %s4890_s10 = smov %s4887_s18 }
 0x361   :  { %3844 = vsyncpa [#allocation3], 1 }
 0x362   :  { %3846 = vsyncpa [#allocation3 + $0x1], 1 }
 0x363   :  { %3847 = vsyncpa [#allocation6], 1 }
 0x364   :  { %3849 = vsyncpa [#allocation6 + $0x1], 1 }
 0x365   :  { %3850 = vsyncpa [#allocation4], 1 }
 0x366   :  { %3852 = vsyncpa [#allocation4 + $0x1], 1 }

</bundles_post_ra>
